<compile_context>
chip_gen: v5e
topology: v5e:2x2
jax: 0.10.0
libtpu: 0.0.40
codegen_flags: <defaults>
</compile_context>

<pallas_src>
import numpy as np
import jax
import jax.numpy as jnp
from jax import lax
from jax.experimental import pallas as pl
from jax.experimental.pallas import tpu as pltpu

# ---- static network dimensions (Linear(656,...) forces input length 185) ----
B = 2            # batch
C_IN = 2         # input channels
L_IN = 185       # input length
K = 5            # conv kernel size
C1 = 6           # conv1 out channels
L1 = L_IN - K + 1            # 181
C2 = 16          # conv2 out channels
P1_OUT = (L1 - 5) // 2 + 1   # 89
L3 = P1_OUT - K + 1          # 85
P2 = (L3 - 5) // 2 + 1       # 41
FLAT = C2 * P2               # 656
H1 = 120
H2 = 84

SC1 = B * C1                 # 12  batch-stacked conv1 channels (sublanes)
SC2 = B * C2                 # 32  batch-stacked conv2 channels (sublanes)
XR = B * K * C_IN + 1        # 21  stacked im2col rows + ones row (bias fold)


# ------------------------- fused conv + pool + FC kernel ----------------------
def fused_kernel(x_ref, w1_ref, pool1_ref, w2_ref, b2_ref, pool2_ref,
                 scat_ref, cmask_ref, rsel_ref, w1p_ref, fb1_ref,
                 w2t_ref, fb2_ref, out_ref):
    # ---- Conv1d(2->6,k5), both samples at once, bias folded via ones row:
    #      (12,21) @ (21,181) -> (12,181), tanh on 4 f32 vregs
    y1 = jnp.dot(w1_ref[...], x_ref[...], preferred_element_type=jnp.float32)
    t1 = jnp.tanh(y1).astype(jnp.bfloat16)                       # (12, 181)

    # ---- AvgPool1d(5,2) + Conv1d(6->16,k5): per-tap pre-shifted 0/1 pool
    #      matmuls then block-diag weight matmuls (1/5 folded into w2), f32 acc
    acc2 = None
    for k in range(K):
        pk = jnp.dot(t1, pool1_ref[k],
                     preferred_element_type=jnp.float32)          # (12, 85)
        tap = jnp.dot(w2_ref[k], pk.astype(jnp.bfloat16),
                      preferred_element_type=jnp.float32)         # (32, 85)
        acc2 = tap if acc2 is None else acc2 + tap
    t2 = jnp.tanh(acc2 + b2_ref[...]).astype(jnp.bfloat16)        # (32, 85)

    # ---- AvgPool1d(5,2) as 0/1 matmul (1/5 folded into fc1 weights)
    pooled = jnp.dot(t2, pool2_ref[...],
                     preferred_element_type=jnp.float32)          # (32, 41)

    # ---- flatten (PyTorch c*41+t order): lane-scatter matmul + 0/1 channel
    #      mask, then the sublane reduction as a (2,32) selector matmul on MXU
    rep = jnp.dot(pooled.astype(jnp.bfloat16), scat_ref[...],
                  preferred_element_type=jnp.float32)             # (32, 656)
    masked = rep.astype(jnp.bfloat16) * cmask_ref[...]            # (32, 656) bf16
    flat = jnp.dot(rsel_ref[...], masked,
                   preferred_element_type=jnp.float32)            # (2, 656)

    # ---- FC head: Linear(656,120) -> tanh -> Linear(120,84)
    h1 = jnp.tanh(jnp.dot(flat.astype(jnp.bfloat16), w1p_ref[...],
                          preferred_element_type=jnp.float32) + fb1_ref[...])
    out_ref[...] = jnp.dot(h1.astype(jnp.bfloat16), w2t_ref[...],
                           preferred_element_type=jnp.float32) + fb2_ref[...]


def run_fused(x_aug, w1_aug, pool1s, w2s, b2c, pool2T, scat, cmask, rsel,
              w1p, fb1r, w2t, fb2r):
    c2 = lambda i: (0, 0)
    c3 = lambda i: (0, 0, 0)
    return pl.pallas_call(
        fused_kernel,
        out_shape=jax.ShapeDtypeStruct((B, H2), jnp.float32),
        grid=(1,),
        in_specs=[
            pl.BlockSpec((XR, L1), c2),          # x (im2col, batch-stacked, +ones)
            pl.BlockSpec((SC1, XR), c2),         # conv1 block-diag W | bias col
            pl.BlockSpec((K, L1, L3), c3),       # 5 pre-shifted 0/1 pool1 mats
            pl.BlockSpec((K, SC2, SC1), c3),     # conv2 per-tap block-diag W * 1/5
            pl.BlockSpec((SC2, 1), c2),          # conv2 bias (f32 column)
            pl.BlockSpec((L3, P2), c2),          # 0/1 pool2
            pl.BlockSpec((P2, FLAT), c2),        # lane scatter (41 -> 656)
            pl.BlockSpec((SC2, FLAT), c2),       # 0/1 channel mask
            pl.BlockSpec((B, SC2), c2),          # batch-row selector (MXU reduce)
            pl.BlockSpec((FLAT, H1), c2),        # fc1 W^T * 1/5
            pl.BlockSpec((1, H1), c2),           # fc1 b (f32)
            pl.BlockSpec((H1, H2), c2),          # fc2 W^T
            pl.BlockSpec((1, H2), c2),           # fc2 b (f32)
        ],
        out_specs=pl.BlockSpec((B, H2), c2),
        compiler_params=pltpu.CompilerParams(
            dimension_semantics=("arbitrary",)),
    )(x_aug, w1_aug, pool1s, w2s, b2c, pool2T, scat, cmask, rsel,
      w1p, fb1r, w2t, fb2r)


# ------------------------------- wrapper (glue) -------------------------------
def _block_diag(m, n):
    r, c = m.shape
    out = jnp.zeros((n * r, n * c), m.dtype)
    for i in range(n):
        out = out.at[i * r:(i + 1) * r, i * c:(i + 1) * c].set(m)
    return out


def cnn1d_forward(x_ncl, params):
    w1, b1, w2, b2, fw1, fb1, fw2, fb2 = params

    # -- input: transposed im2col, batch stacked on sublanes, + ones row (bias)
    #    x_aug[b*10 + (k*2+c), t] = x[b, c, t+k];  x_aug[20, t] = 1
    shifted = jnp.stack([x_ncl[:, :, k:k + L1] for k in range(K)], axis=1)
    x_stack = shifted.reshape(B * K * C_IN, L1)                   # (20, 181)
    x_aug = jnp.concatenate(
        [x_stack, jnp.ones((1, L1), x_stack.dtype)], axis=0
    ).astype(jnp.bfloat16)                                        # (21, 181)

    # -- conv1: w1fT[o, k*2+c] = w1[o,c,k]; block-diag over batch; bias column
    w1fT = jnp.transpose(w1, (0, 2, 1)).reshape(C1, K * C_IN)     # (6, 10)
    w1_bd = _block_diag(w1fT, B)                                  # (12, 20)
    w1_aug = jnp.concatenate([w1_bd, jnp.tile(b1, B)[:, None]],
                             axis=1).astype(jnp.bfloat16)         # (12, 21)

    # -- 5 pre-shifted EXACT 0/1 pool1 matrices (sum pooling)
    p1 = np.zeros((K, L1, L3), np.float32)
    for k in range(K):
        for t in range(L3):
            p1[k, 2 * (t + k):2 * (t + k) + 5, t] = 1.0
    pool1s = jnp.asarray(p1, jnp.bfloat16)                        # (5, 181, 85)

    # -- conv2 per-tap weights, pool1's 1/5 folded in f32, block-diag over batch
    w2s = jnp.stack([_block_diag(w2[:, :, k] * 0.2, B) for k in range(K)],
                    axis=0).astype(jnp.bfloat16)                  # (5, 32, 12)
    b2c = jnp.tile(b2, B)[:, None].astype(jnp.float32)            # (32, 1)

    # -- EXACT 0/1 pool2 (its 1/5 folded into fc1 weights)
    p2 = np.zeros((L3, P2), np.float32)
    for t in range(P2):
        p2[2 * t:2 * t + 5, t] = 1.0
    pool2T = jnp.asarray(p2, jnp.bfloat16)                        # (85, 41)

    # -- flatten constants: lane scatter, channel mask, batch-row selector
    scat = jnp.asarray(np.tile(np.eye(P2, dtype=np.float32), (1, C2)),
                       jnp.bfloat16)                              # (41, 656)
    cm = np.zeros((C2, FLAT), np.float32)
    for c in range(C2):
        cm[c, c * P2:(c + 1) * P2] = 1.0
    cmask = jnp.asarray(np.tile(cm, (B, 1)), jnp.bfloat16)        # (32, 656)
    rsel = jnp.asarray(np.kron(np.eye(B, dtype=np.float32),
                               np.ones((1, C2), np.float32)),
                       jnp.bfloat16)                              # (2, 32)

    # -- FC weights (pool2's 1/5 folded in f32 into fc1), biases kept f32
    w1p = (fw1 * 0.2).T.astype(jnp.bfloat16)                      # (656, 120)
    w2t = fw2.T.astype(jnp.bfloat16)                              # (120, 84)

    return run_fused(x_aug, w1_aug, pool1s, w2s, b2c, pool2T, scat, cmask,
                     rsel, w1p, fb1.reshape(1, H1).astype(jnp.float32),
                     w2t, fb2.reshape(1, H2).astype(jnp.float32))


# ------------------------------ reference (JAX) -------------------------------
def reference_forward(x_ncl, params):
    w1, b1, w2, b2, fw1, fb1, fw2, fb2 = params
    dn = ("NCH", "OIH", "NCH")
    y = lax.conv_general_dilated(x_ncl, w1, (1,), "VALID", dimension_numbers=dn)
    y = jnp.tanh(y + b1[None, :, None])
    y = lax.reduce_window(y, 0.0, lax.add, (1, 1, 5), (1, 1, 2), "VALID") / 5.0
    y = lax.conv_general_dilated(y, w2, (1,), "VALID", dimension_numbers=dn)
    y = jnp.tanh(y + b2[None, :, None])
    y = lax.reduce_window(y, 0.0, lax.add, (1, 1, 5), (1, 1, 2), "VALID") / 5.0
    flat = y.reshape(y.shape[0], -1)
    h = jnp.tanh(flat @ fw1.T + fb1)
    return h @ fw2.T + fb2


def init_params(key):
    def u(k, shape, fan_in):
        bound = 1.0 / np.sqrt(fan_in)
        return jax.random.uniform(k, shape, jnp.float32, -bound, bound)

    ks = jax.random.split(key, 8)
    w1 = u(ks[0], (C1, C_IN, K), C_IN * K)
    b1 = u(ks[1], (C1,), C_IN * K)
    w2 = u(ks[2], (C2, C1, K), C1 * K)
    b2 = u(ks[3], (C2,), C1 * K)
    fw1 = u(ks[4], (H1, FLAT), FLAT)
    fb1 = u(ks[5], (H1,), FLAT)
    fw2 = u(ks[6], (H2, H1), H1)
    fb2 = u(ks[7], (H2,), H1)
    return (w1, b1, w2, b2, fw1, fb1, fw2, fb2)


if __name__ == "__main__":
    key = jax.random.PRNGKey(0)
    k_x, k_p = jax.random.split(key)
    x = jax.random.normal(k_x, (B, C_IN, L_IN), jnp.float32)   # NCL, like PyTorch
    params = init_params(k_p)

    out = cnn1d_forward(x, params)
    out = jax.block_until_ready(out)
    assert out.shape == (B, H2), out.shape

    ref = jax.block_until_ready(reference_forward(x, params))
    assert jnp.allclose(out, ref, rtol=2e-2, atol=2e-2), (
        float(jnp.max(jnp.abs(out - ref))))

    print("KERNEL_OK")
</pallas_src>

<mosaic_0001>
module attributes {stable_mosaic.version = 11 : i64} {
  func.func @fused_kernel(%arg0: i32, %arg1: memref<21x181xbf16, #tpu.memory_space<vmem>>, %arg2: memref<12x21xbf16, #tpu.memory_space<vmem>>, %arg3: memref<5x181x85xbf16, #tpu.memory_space<vmem>>, %arg4: memref<5x32x12xbf16, #tpu.memory_space<vmem>>, %arg5: memref<32x1xf32, #tpu.memory_space<vmem>>, %arg6: memref<85x41xbf16, #tpu.memory_space<vmem>>, %arg7: memref<41x656xbf16, #tpu.memory_space<vmem>>, %arg8: memref<32x656xbf16, #tpu.memory_space<vmem>>, %arg9: memref<2x32xbf16, #tpu.memory_space<vmem>>, %arg10: memref<656x120xbf16, #tpu.memory_space<vmem>>, %arg11: memref<1x120xf32, #tpu.memory_space<vmem>>, %arg12: memref<120x84xbf16, #tpu.memory_space<vmem>>, %arg13: memref<1x84xf32, #tpu.memory_space<vmem>>, %arg14: memref<2x84xf32, #tpu.memory_space<vmem>>) attributes {dimension_semantics = [#tpu.dimension_semantics<arbitrary>], iteration_bounds = array<i64: 1>, scalar_prefetch = 0 : i64, scratch_operands = 0 : i64, tpu.core_type = #tpu.core_type<tc>, window_params = [{pipeline_mode = #tpu.pipeline_mode<synchronous>, transform_indices = @transform_0, window_bounds = array<i64: 21, 181>}, {pipeline_mode = #tpu.pipeline_mode<synchronous>, transform_indices = @transform_1, window_bounds = array<i64: 12, 21>}, {pipeline_mode = #tpu.pipeline_mode<synchronous>, transform_indices = @transform_2, window_bounds = array<i64: 5, 181, 85>}, {pipeline_mode = #tpu.pipeline_mode<synchronous>, transform_indices = @transform_3, window_bounds = array<i64: 5, 32, 12>}, {pipeline_mode = #tpu.pipeline_mode<synchronous>, transform_indices = @transform_4, window_bounds = array<i64: 32, 1>}, {pipeline_mode = #tpu.pipeline_mode<synchronous>, transform_indices = @transform_5, window_bounds = array<i64: 85, 41>}, {pipeline_mode = #tpu.pipeline_mode<synchronous>, transform_indices = @transform_6, window_bounds = array<i64: 41, 656>}, {pipeline_mode = #tpu.pipeline_mode<synchronous>, transform_indices = @transform_7, window_bounds = array<i64: 32, 656>}, {pipeline_mode = #tpu.pipeline_mode<synchronous>, transform_indices = @transform_8, window_bounds = array<i64: 2, 32>}, {pipeline_mode = #tpu.pipeline_mode<synchronous>, transform_indices = @transform_9, window_bounds = array<i64: 656, 120>}, {pipeline_mode = #tpu.pipeline_mode<synchronous>, transform_indices = @transform_10, window_bounds = array<i64: 1, 120>}, {pipeline_mode = #tpu.pipeline_mode<synchronous>, transform_indices = @transform_11, window_bounds = array<i64: 120, 84>}, {pipeline_mode = #tpu.pipeline_mode<synchronous>, transform_indices = @transform_12, window_bounds = array<i64: 1, 84>}, {pipeline_mode = #tpu.pipeline_mode<synchronous>, transform_indices = @transform_13, window_bounds = array<i64: 2, 84>}]} {
    %c0 = arith.constant 0 : index
    %c0_0 = arith.constant 0 : index
    %0 = vector.load %arg2[%c0, %c0_0] : memref<12x21xbf16, #tpu.memory_space<vmem>>, vector<12x21xbf16>
    %c0_1 = arith.constant 0 : index
    %c0_2 = arith.constant 0 : index
    %1 = vector.load %arg1[%c0_1, %c0_2] : memref<21x181xbf16, #tpu.memory_space<vmem>>, vector<21x181xbf16>
    %cst = arith.constant dense<0.000000e+00> : vector<12x181xf32>
    %2 = tpu.matmul %0, %1, %cst {dimension_numbers = #tpu.dot_dimension_numbers<[1], [0], [0], [1], [0, 0, 1, 1], [], []>} : vector<12x21xbf16>, vector<21x181xbf16>, vector<12x181xf32> -> vector<12x181xf32>
    %3 = math.tanh %2 : vector<12x181xf32>
    %4 = arith.truncf %3 : vector<12x181xf32> to vector<12x181xbf16>
    %c0_3 = arith.constant 0 : index
    %c0_4 = arith.constant 0 : index
    %c0_5 = arith.constant 0 : index
    %5 = vector.load %arg3[%c0_3, %c0_4, %c0_5] : memref<5x181x85xbf16, #tpu.memory_space<vmem>>, vector<1x181x85xbf16>
    %6 = vector.shape_cast %5 : vector<1x181x85xbf16> to vector<181x85xbf16>
    %cst_6 = arith.constant dense<0.000000e+00> : vector<12x85xf32>
    %7 = tpu.matmul %4, %6, %cst_6 {dimension_numbers = #tpu.dot_dimension_numbers<[1], [0], [0], [1], [0, 0, 1, 1], [], []>} : vector<12x181xbf16>, vector<181x85xbf16>, vector<12x85xf32> -> vector<12x85xf32>
    %c0_7 = arith.constant 0 : index
    %c0_8 = arith.constant 0 : index
    %c0_9 = arith.constant 0 : index
    %8 = vector.load %arg4[%c0_7, %c0_8, %c0_9] : memref<5x32x12xbf16, #tpu.memory_space<vmem>>, vector<1x32x12xbf16>
    %9 = vector.shape_cast %8 : vector<1x32x12xbf16> to vector<32x12xbf16>
    %10 = arith.truncf %7 : vector<12x85xf32> to vector<12x85xbf16>
    %cst_10 = arith.constant dense<0.000000e+00> : vector<32x85xf32>
    %11 = tpu.matmul %9, %10, %cst_10 {dimension_numbers = #tpu.dot_dimension_numbers<[1], [0], [0], [1], [0, 0, 1, 1], [], []>} : vector<32x12xbf16>, vector<12x85xbf16>, vector<32x85xf32> -> vector<32x85xf32>
    %c1 = arith.constant 1 : index
    %c0_11 = arith.constant 0 : index
    %c0_12 = arith.constant 0 : index
    %12 = vector.load %arg3[%c1, %c0_11, %c0_12] : memref<5x181x85xbf16, #tpu.memory_space<vmem>>, vector<1x181x85xbf16>
    %13 = vector.shape_cast %12 : vector<1x181x85xbf16> to vector<181x85xbf16>
    %cst_13 = arith.constant dense<0.000000e+00> : vector<12x85xf32>
    %14 = tpu.matmul %4, %13, %cst_13 {dimension_numbers = #tpu.dot_dimension_numbers<[1], [0], [0], [1], [0, 0, 1, 1], [], []>} : vector<12x181xbf16>, vector<181x85xbf16>, vector<12x85xf32> -> vector<12x85xf32>
    %c1_14 = arith.constant 1 : index
    %c0_15 = arith.constant 0 : index
    %c0_16 = arith.constant 0 : index
    %15 = vector.load %arg4[%c1_14, %c0_15, %c0_16] : memref<5x32x12xbf16, #tpu.memory_space<vmem>>, vector<1x32x12xbf16>
    %16 = vector.shape_cast %15 : vector<1x32x12xbf16> to vector<32x12xbf16>
    %17 = arith.truncf %14 : vector<12x85xf32> to vector<12x85xbf16>
    %cst_17 = arith.constant dense<0.000000e+00> : vector<32x85xf32>
    %18 = tpu.matmul %16, %17, %cst_17 {dimension_numbers = #tpu.dot_dimension_numbers<[1], [0], [0], [1], [0, 0, 1, 1], [], []>} : vector<32x12xbf16>, vector<12x85xbf16>, vector<32x85xf32> -> vector<32x85xf32>
    %19 = arith.addf %11, %18 : vector<32x85xf32>
    %c2 = arith.constant 2 : index
    %c0_18 = arith.constant 0 : index
    %c0_19 = arith.constant 0 : index
    %20 = vector.load %arg3[%c2, %c0_18, %c0_19] : memref<5x181x85xbf16, #tpu.memory_space<vmem>>, vector<1x181x85xbf16>
    %21 = vector.shape_cast %20 : vector<1x181x85xbf16> to vector<181x85xbf16>
    %cst_20 = arith.constant dense<0.000000e+00> : vector<12x85xf32>
    %22 = tpu.matmul %4, %21, %cst_20 {dimension_numbers = #tpu.dot_dimension_numbers<[1], [0], [0], [1], [0, 0, 1, 1], [], []>} : vector<12x181xbf16>, vector<181x85xbf16>, vector<12x85xf32> -> vector<12x85xf32>
    %c2_21 = arith.constant 2 : index
    %c0_22 = arith.constant 0 : index
    %c0_23 = arith.constant 0 : index
    %23 = vector.load %arg4[%c2_21, %c0_22, %c0_23] : memref<5x32x12xbf16, #tpu.memory_space<vmem>>, vector<1x32x12xbf16>
    %24 = vector.shape_cast %23 : vector<1x32x12xbf16> to vector<32x12xbf16>
    %25 = arith.truncf %22 : vector<12x85xf32> to vector<12x85xbf16>
    %cst_24 = arith.constant dense<0.000000e+00> : vector<32x85xf32>
    %26 = tpu.matmul %24, %25, %cst_24 {dimension_numbers = #tpu.dot_dimension_numbers<[1], [0], [0], [1], [0, 0, 1, 1], [], []>} : vector<32x12xbf16>, vector<12x85xbf16>, vector<32x85xf32> -> vector<32x85xf32>
    %27 = arith.addf %19, %26 : vector<32x85xf32>
    %c3 = arith.constant 3 : index
    %c0_25 = arith.constant 0 : index
    %c0_26 = arith.constant 0 : index
    %28 = vector.load %arg3[%c3, %c0_25, %c0_26] : memref<5x181x85xbf16, #tpu.memory_space<vmem>>, vector<1x181x85xbf16>
    %29 = vector.shape_cast %28 : vector<1x181x85xbf16> to vector<181x85xbf16>
    %cst_27 = arith.constant dense<0.000000e+00> : vector<12x85xf32>
    %30 = tpu.matmul %4, %29, %cst_27 {dimension_numbers = #tpu.dot_dimension_numbers<[1], [0], [0], [1], [0, 0, 1, 1], [], []>} : vector<12x181xbf16>, vector<181x85xbf16>, vector<12x85xf32> -> vector<12x85xf32>
    %c3_28 = arith.constant 3 : index
    %c0_29 = arith.constant 0 : index
    %c0_30 = arith.constant 0 : index
    %31 = vector.load %arg4[%c3_28, %c0_29, %c0_30] : memref<5x32x12xbf16, #tpu.memory_space<vmem>>, vector<1x32x12xbf16>
    %32 = vector.shape_cast %31 : vector<1x32x12xbf16> to vector<32x12xbf16>
    %33 = arith.truncf %30 : vector<12x85xf32> to vector<12x85xbf16>
    %cst_31 = arith.constant dense<0.000000e+00> : vector<32x85xf32>
    %34 = tpu.matmul %32, %33, %cst_31 {dimension_numbers = #tpu.dot_dimension_numbers<[1], [0], [0], [1], [0, 0, 1, 1], [], []>} : vector<32x12xbf16>, vector<12x85xbf16>, vector<32x85xf32> -> vector<32x85xf32>
    %35 = arith.addf %27, %34 : vector<32x85xf32>
    %c4 = arith.constant 4 : index
    %c0_32 = arith.constant 0 : index
    %c0_33 = arith.constant 0 : index
    %36 = vector.load %arg3[%c4, %c0_32, %c0_33] : memref<5x181x85xbf16, #tpu.memory_space<vmem>>, vector<1x181x85xbf16>
    %37 = vector.shape_cast %36 : vector<1x181x85xbf16> to vector<181x85xbf16>
    %cst_34 = arith.constant dense<0.000000e+00> : vector<12x85xf32>
    %38 = tpu.matmul %4, %37, %cst_34 {dimension_numbers = #tpu.dot_dimension_numbers<[1], [0], [0], [1], [0, 0, 1, 1], [], []>} : vector<12x181xbf16>, vector<181x85xbf16>, vector<12x85xf32> -> vector<12x85xf32>
    %c4_35 = arith.constant 4 : index
    %c0_36 = arith.constant 0 : index
    %c0_37 = arith.constant 0 : index
    %39 = vector.load %arg4[%c4_35, %c0_36, %c0_37] : memref<5x32x12xbf16, #tpu.memory_space<vmem>>, vector<1x32x12xbf16>
    %40 = vector.shape_cast %39 : vector<1x32x12xbf16> to vector<32x12xbf16>
    %41 = arith.truncf %38 : vector<12x85xf32> to vector<12x85xbf16>
    %cst_38 = arith.constant dense<0.000000e+00> : vector<32x85xf32>
    %42 = tpu.matmul %40, %41, %cst_38 {dimension_numbers = #tpu.dot_dimension_numbers<[1], [0], [0], [1], [0, 0, 1, 1], [], []>} : vector<32x12xbf16>, vector<12x85xbf16>, vector<32x85xf32> -> vector<32x85xf32>
    %43 = arith.addf %35, %42 : vector<32x85xf32>
    %c0_39 = arith.constant 0 : index
    %c0_40 = arith.constant 0 : index
    %44 = vector.load %arg5[%c0_39, %c0_40] : memref<32x1xf32, #tpu.memory_space<vmem>>, vector<32x1xf32>
    %45 = vector.broadcast %44 : vector<32x1xf32> to vector<32x85xf32>
    %46 = arith.addf %43, %45 : vector<32x85xf32>
    %47 = math.tanh %46 : vector<32x85xf32>
    %48 = arith.truncf %47 : vector<32x85xf32> to vector<32x85xbf16>
    %c0_41 = arith.constant 0 : index
    %c0_42 = arith.constant 0 : index
    %49 = vector.load %arg6[%c0_41, %c0_42] : memref<85x41xbf16, #tpu.memory_space<vmem>>, vector<85x41xbf16>
    %cst_43 = arith.constant dense<0.000000e+00> : vector<32x41xf32>
    %50 = tpu.matmul %48, %49, %cst_43 {dimension_numbers = #tpu.dot_dimension_numbers<[1], [0], [0], [1], [0, 0, 1, 1], [], []>} : vector<32x85xbf16>, vector<85x41xbf16>, vector<32x41xf32> -> vector<32x41xf32>
    %51 = arith.truncf %50 : vector<32x41xf32> to vector<32x41xbf16>
    %c0_44 = arith.constant 0 : index
    %c0_45 = arith.constant 0 : index
    %52 = vector.load %arg7[%c0_44, %c0_45] : memref<41x656xbf16, #tpu.memory_space<vmem>>, vector<41x656xbf16>
    %cst_46 = arith.constant dense<0.000000e+00> : vector<32x656xf32>
    %53 = tpu.matmul %51, %52, %cst_46 {dimension_numbers = #tpu.dot_dimension_numbers<[1], [0], [0], [1], [0, 0, 1, 1], [], []>} : vector<32x41xbf16>, vector<41x656xbf16>, vector<32x656xf32> -> vector<32x656xf32>
    %54 = arith.truncf %53 : vector<32x656xf32> to vector<32x656xbf16>
    %c0_47 = arith.constant 0 : index
    %c0_48 = arith.constant 0 : index
    %55 = vector.load %arg8[%c0_47, %c0_48] : memref<32x656xbf16, #tpu.memory_space<vmem>>, vector<32x656xbf16>
    %56 = arith.mulf %54, %55 : vector<32x656xbf16>
    %c0_49 = arith.constant 0 : index
    %c0_50 = arith.constant 0 : index
    %57 = vector.load %arg9[%c0_49, %c0_50] : memref<2x32xbf16, #tpu.memory_space<vmem>>, vector<2x32xbf16>
    %cst_51 = arith.constant dense<0.000000e+00> : vector<2x656xf32>
    %58 = tpu.matmul %57, %56, %cst_51 {dimension_numbers = #tpu.dot_dimension_numbers<[1], [0], [0], [1], [0, 0, 1, 1], [], []>} : vector<2x32xbf16>, vector<32x656xbf16>, vector<2x656xf32> -> vector<2x656xf32>
    %59 = arith.truncf %58 : vector<2x656xf32> to vector<2x656xbf16>
    %c0_52 = arith.constant 0 : index
    %c0_53 = arith.constant 0 : index
    %60 = vector.load %arg10[%c0_52, %c0_53] : memref<656x120xbf16, #tpu.memory_space<vmem>>, vector<656x120xbf16>
    %cst_54 = arith.constant dense<0.000000e+00> : vector<2x120xf32>
    %61 = tpu.matmul %59, %60, %cst_54 {dimension_numbers = #tpu.dot_dimension_numbers<[1], [0], [0], [1], [0, 0, 1, 1], [], []>} : vector<2x656xbf16>, vector<656x120xbf16>, vector<2x120xf32> -> vector<2x120xf32>
    %c0_55 = arith.constant 0 : index
    %c0_56 = arith.constant 0 : index
    %62 = vector.load %arg11[%c0_55, %c0_56] : memref<1x120xf32, #tpu.memory_space<vmem>>, vector<1x120xf32>
    %63 = vector.broadcast %62 : vector<1x120xf32> to vector<2x120xf32>
    %64 = arith.addf %61, %63 : vector<2x120xf32>
    %65 = math.tanh %64 : vector<2x120xf32>
    %66 = arith.truncf %65 : vector<2x120xf32> to vector<2x120xbf16>
    %c0_57 = arith.constant 0 : index
    %c0_58 = arith.constant 0 : index
    %67 = vector.load %arg12[%c0_57, %c0_58] : memref<120x84xbf16, #tpu.memory_space<vmem>>, vector<120x84xbf16>
    %cst_59 = arith.constant dense<0.000000e+00> : vector<2x84xf32>
    %68 = tpu.matmul %66, %67, %cst_59 {dimension_numbers = #tpu.dot_dimension_numbers<[1], [0], [0], [1], [0, 0, 1, 1], [], []>} : vector<2x120xbf16>, vector<120x84xbf16>, vector<2x84xf32> -> vector<2x84xf32>
    %c0_60 = arith.constant 0 : index
    %c0_61 = arith.constant 0 : index
    %69 = vector.load %arg13[%c0_60, %c0_61] : memref<1x84xf32, #tpu.memory_space<vmem>>, vector<1x84xf32>
    %70 = vector.broadcast %69 : vector<1x84xf32> to vector<2x84xf32>
    %71 = arith.addf %68, %70 : vector<2x84xf32>
    %c0_62 = arith.constant 0 : index
    %c0_63 = arith.constant 0 : index
    %72 = vector.load %arg14[%c0_62, %c0_63] : memref<2x84xf32, #tpu.memory_space<vmem>>, vector<2x84xf32>
    tpu.vector_store %arg14[%c0_62, %c0_63], %71 {strides = array<i32>} : memref<2x84xf32, #tpu.memory_space<vmem>>, vector<2x84xf32>,
    return
  }
  func.func @transform_0(%arg0: i32) -> (i32, i32) {
    %c0_i32 = arith.constant 0 : i32
    %c0_i32_0 = arith.constant 0 : i32
    %c0_i32_1 = arith.constant 0 : i32
    return %c0_i32, %c0_i32_0 : i32, i32
  }
  func.func @transform_1(%arg0: i32) -> (i32, i32) {
    %c0_i32 = arith.constant 0 : i32
    %c0_i32_0 = arith.constant 0 : i32
    %c0_i32_1 = arith.constant 0 : i32
    return %c0_i32, %c0_i32_0 : i32, i32
  }
  func.func @transform_2(%arg0: i32) -> (i32, i32, i32) {
    %c0_i32 = arith.constant 0 : i32
    %c0_i32_0 = arith.constant 0 : i32
    %c0_i32_1 = arith.constant 0 : i32
    %c0_i32_2 = arith.constant 0 : i32
    return %c0_i32, %c0_i32_0, %c0_i32_1 : i32, i32, i32
  }
  func.func @transform_3(%arg0: i32) -> (i32, i32, i32) {
    %c0_i32 = arith.constant 0 : i32
    %c0_i32_0 = arith.constant 0 : i32
    %c0_i32_1 = arith.constant 0 : i32
    %c0_i32_2 = arith.constant 0 : i32
    return %c0_i32, %c0_i32_0, %c0_i32_1 : i32, i32, i32
  }
  func.func @transform_4(%arg0: i32) -> (i32, i32) {
    %c0_i32 = arith.constant 0 : i32
    %c0_i32_0 = arith.constant 0 : i32
    %c0_i32_1 = arith.constant 0 : i32
    return %c0_i32, %c0_i32_0 : i32, i32
  }
  func.func @transform_5(%arg0: i32) -> (i32, i32) {
    %c0_i32 = arith.constant 0 : i32
    %c0_i32_0 = arith.constant 0 : i32
    %c0_i32_1 = arith.constant 0 : i32
    return %c0_i32, %c0_i32_0 : i32, i32
  }
  func.func @transform_6(%arg0: i32) -> (i32, i32) {
    %c0_i32 = arith.constant 0 : i32
    %c0_i32_0 = arith.constant 0 : i32
    %c0_i32_1 = arith.constant 0 : i32
    return %c0_i32, %c0_i32_0 : i32, i32
  }
  func.func @transform_7(%arg0: i32) -> (i32, i32) {
    %c0_i32 = arith.constant 0 : i32
    %c0_i32_0 = arith.constant 0 : i32
    %c0_i32_1 = arith.constant 0 : i32
    return %c0_i32, %c0_i32_0 : i32, i32
  }
  func.func @transform_8(%arg0: i32) -> (i32, i32) {
    %c0_i32 = arith.constant 0 : i32
    %c0_i32_0 = arith.constant 0 : i32
    %c0_i32_1 = arith.constant 0 : i32
    return %c0_i32, %c0_i32_0 : i32, i32
  }
  func.func @transform_9(%arg0: i32) -> (i32, i32) {
    %c0_i32 = arith.constant 0 : i32
    %c0_i32_0 = arith.constant 0 : i32
    %c0_i32_1 = arith.constant 0 : i32
    return %c0_i32, %c0_i32_0 : i32, i32
  }
  func.func @transform_10(%arg0: i32) -> (i32, i32) {
    %c0_i32 = arith.constant 0 : i32
    %c0_i32_0 = arith.constant 0 : i32
    %c0_i32_1 = arith.constant 0 : i32
    return %c0_i32, %c0_i32_0 : i32, i32
  }
  func.func @transform_11(%arg0: i32) -> (i32, i32) {
    %c0_i32 = arith.constant 0 : i32
    %c0_i32_0 = arith.constant 0 : i32
    %c0_i32_1 = arith.constant 0 : i32
    return %c0_i32, %c0_i32_0 : i32, i32
  }
  func.func @transform_12(%arg0: i32) -> (i32, i32) {
    %c0_i32 = arith.constant 0 : i32
    %c0_i32_0 = arith.constant 0 : i32
    %c0_i32_1 = arith.constant 0 : i32
    return %c0_i32, %c0_i32_0 : i32, i32
  }
  func.func @transform_13(%arg0: i32) -> (i32, i32) {
    %c0_i32 = arith.constant 0 : i32
    %c0_i32_0 = arith.constant 0 : i32
    %c0_i32_1 = arith.constant 0 : i32
    return %c0_i32, %c0_i32_0 : i32, i32
  }
}

</mosaic_0001>

<bundles_post_ra>
// kernel: tpu_custom_call.1
= control target key start
LH: loop header
LB: loop body
LE: loop exit
PB: predicated region body
PF: predicated region fallthrough
CT: control target
= control target key end

     0   :  { %vm75_vm0 = vcmask 1041408   ;;  %vm76_vm1 = vcmask 1042432   ;;  %v2937_v2 = vmov 65535   ;;  %s3652_s0 = inlined_call_operand.vmem [shape: bf16[21,181], index: 0, kind: input, shape index: {}]   ;;  %s3653_s1 = inlined_call_operand.vmem [shape: bf16[12,21], index: 1, kind: input, shape index: {}]   ;;  %s3654_s2 = inlined_call_operand.vmem [shape: bf16[5,181,85], index: 2, kind: input, shape index: {}]   ;;  %s3655_s3 = inlined_call_operand.vmem [shape: bf16[5,32,12], index: 3, kind: input, shape index: {}]   ;;  %s3656_s4 = inlined_call_operand.vmem [shape: f32[32,1], index: 4, kind: input, shape index: {}]   ;;  %s3657_s5 = inlined_call_operand.vmem [shape: bf16[85,41], index: 5, kind: input, shape index: {}]   ;;  %s3658_s6 = inlined_call_operand.vmem [shape: bf16[41,656], index: 6, kind: input, shape index: {}]   ;;  %s3659_s7 = inlined_call_operand.vmem [shape: bf16[32,656], index: 7, kind: input, shape index: {}]   ;;  %s3660_s8 = inlined_call_operand.vmem [shape: bf16[2,32], index: 8, kind: input, shape index: {}]   ;;  %s3661_s9 = inlined_call_operand.vmem [shape: bf16[656,120], index: 9, kind: input, shape index: {}]   ;;  %s3662_s10 = inlined_call_operand.vmem [shape: f32[1,120], index: 10, kind: input, shape index: {}]   ;;  %s3663_s11 = inlined_call_operand.vmem [shape: bf16[120,84], index: 11, kind: input, shape index: {}]   ;;  %s3664_s12 = inlined_call_operand.vmem [shape: f32[1,84], index: 12, kind: input, shape index: {}]   ;;  %s3665_s13 = inlined_call_operand.hbm [shape: f32[2,84], index: 13, kind: output, shape index: {}]  }
   0x1   :  { %v50_v0 = vld [vmem:[%s3652_s0 + $0x10] sm:$0x77]  ;;  %v77_v3 = vsel %vm75_vm0, 4294967295, %v2937_v2  ;;  %v2757_v5 = vld [vmem:[%s3654_s2 + $0x38] sm:$0xff]  ;;  %v2050_v9 = vld [vmem:[%s3652_s0] sm:$0xf] }
   0x2   :  { %v63_v1 = vunpack.c.l.b16 %v50_v0  ;;  %v64_v4 = vunpack.c.h.b16 %v50_v0  ;;  %v3017_v6 = vsel %vm76_vm1, %v77_v3, 0  ;;  %218 = vmatpush.bf16.msra.mxu2 %v2757_v5  ;;  %v2756_v8 = vld [vmem:[%s3654_s2 + $0x30] sm:$0xff]  ;;  %v2749_v10 = vld [vmem:[%s3652_s0 + $0x4] sm:$0xf0]  ;;  %v2046_v14 = vld [vmem:[%s3653_s1] sm:$0xf] }
   0x3   :  { %v2770_v12 = vld [vmem:[%s3654_s2 + $0x94] sm:$0xff]  ;;  %v2747_v15 = vld [vmem:[%s3653_s1] sm:$0x30]  ;;  %v2769_v16 = vld [vmem:[%s3654_s2 + $0x8c] sm:$0xff]  ;;  %v2051_v17 = vor.u32 %v2749_v10, %v2050_v9 }
   0x4   :  { %v67_v7 = vpack.c.b16 %v63_v1, %v63_v1  ;;  %v68_v11 = vpack.c.b16 %v64_v4, %v64_v4  ;;  %347 = vmatpush.bf16.msra.mxu0 %v2770_v12  ;;  %v2755_v18 = vld [vmem:[%s3654_s2 + $0x28] sm:$0xff] }
   0x6   :  { %v80_v13 = vand.u32 %v3017_v6, %v67_v7  ;;  %219 = vmatpush.bf16.msra.mxu2 %v2756_v8 }
   0x8   :  { %91 = vmatpush.bf16.msra.mxu1 %v80_v13 }
   0x9   :  { %18 = vsyncpa [#allocation3], 0  ;;  %v83_v19 = vand.u32 %v3017_v6, %v68_v11  ;;  %v2748_v20 = vld [vmem:[%s3652_s0 + $0x4] sm:$0xf]  ;;  %v2052_v21 = vld [vmem:[%s3652_s0 + $0x8] sm:$0xf0]  ;;  %v2047_v22 = vor.u32 %v2747_v15, %v2046_v14  ;;  %348 = vmatpush.bf16.msra.mxu0 %v2769_v16 }
   0xa   :  { %v2768_v23 = vld [vmem:[%s3654_s2 + $0x84] sm:$0xff]  ;;  %vm71_vm2 = vcmask 171008   ;;  %220 = vmatpush.bf16.msra.mxu2 %v2755_v18  ;;  %v2055_v25 = vor.u32 %v2748_v20, %v2052_v21  ;;  %v2767_v26 = vld [vmem:[%s3654_s2 + $0x7c] sm:$0xff]  ;;  %v2752_v28 = vld [vmem:[%s3654_s2 + $0x10] sm:$0xff]  ;;  %vm211_vm3 = vcmask 433152   ;;  %vm398_vm4 = vcmask 1045504  }
   0xb   :  { %v2754_v24 = vld [vmem:[%s3654_s2 + $0x20] sm:$0xff]  ;;  %v2753_v27 = vld [vmem:[%s3654_s2 + $0x18] sm:$0xff]  ;;  %v2751_v29 = vld [vmem:[%s3654_s2 + $0x8] sm:$0xff]  ;;  %vm391_vm5 = vcmask 97280   ;;  %vm1053_vm6 = vcmask 695296   ;;  %vm1193_vm7 = vcmask 1043456  }
   0xc   :  { %92 = vmatpush.bf16.msra.mxu1 %v2051_v17  ;;  %v2750_v30 = vld [vmem:[%s3654_s2] sm:$0xff]  ;;  %v2766_v31 = vld [vmem:[%s3654_s2 + $0x74] sm:$0xff]  ;;  %v2765_v33 = vld [vmem:[%s3654_s2 + $0x6c] sm:$0xff]  ;;  %vm1194_vm8 = vcmask 1044480   ;;  %vm1186_vm9 = vcmask 334848   ;;  %vm1438_vm10 = vcmask 261120  }
   0xd   :  { %349 = vmatpush.bf16.msra.mxu0 %v2768_v23  ;;  %v2783_v32 = vld [vmem:[%s3654_s2 + $0xf0] sm:$0xff]  ;;  %v2782_v34 = vld [vmem:[%s3654_s2 + $0xe8] sm:$0xff]  ;;  %v2781_v36 = vld [vmem:[%s3654_s2 + $0xe0] sm:$0xff]  ;;  %vm1858_vm11 = vcmask 130048   ;;  %vm2006_vm12 = vcmask 982016   ;;  %vm2026_vm13 = vcmask 680960  }
   0xe   :  { %221 = vmatpush.bf16.msra.mxu2 %v2754_v24  ;;  %v2764_v35 = vld [vmem:[%s3654_s2 + $0x64] sm:$0xff]  ;;  %v141_v37 = vld [vmem:[%s3654_s2 + $0x58] sm:$0x7]  ;;  %v2125_v38 = vld [vmem:[%s3654_s2 + $0xb4] sm:$0x7] }
   0xf   :  { %2056 = vmatmul.msk.bf16.vlgmr.msra.gmra.mxu1 %vm71_vm2, %v2047_v22  ;;  %v2217_v39 = vld [vmem:[%s3654_s2 + $0x110] sm:$0x7]  ;;  %v2763_v40 = vld [vmem:[%s3654_s2 + $0x5c] sm:$0xff]  ;;  %v187_v42 = vunpack.c.l.b16 %v141_v37  ;;  %v320_v43 = vunpack.c.l.b16 %v2125_v38  ;;  %v2778_v54 = vld [vmem:[%s3654_s2 + $0xc8] sm:$0xff] }
  0x10   :  { %105 = vmatpush.bf16.msrb.mxu1 %v83_v19  ;;  %v2780_v41 = vld [vmem:[%s3654_s2 + $0xd8] sm:$0xff]  ;;  %v528_v44 = vunpack.c.l.b16 %v2217_v39  ;;  %v2779_v50 = vld [vmem:[%s3654_s2 + $0xd0] sm:$0xff]  ;;  %v2786_v55 = vld [vmem:[%s3654_s2 + $0x108] sm:$0xff] }
  0x11   :  { %350 = vmatpush.bf16.msra.mxu0 %v2767_v26  ;;  %v199_v45 = vpack.c.b16 %v187_v42, %v187_v42  ;;  %v332_v46 = vpack.c.b16 %v320_v43, %v320_v43  ;;  %v2760_v52 = vld [vmem:[%s3654_s2 + $0x50] sm:$0xff]  ;;  %v2759_v56 = vld [vmem:[%s3654_s2 + $0x48] sm:$0xff]  ;;  %v2777_v58 = vld [vmem:[%s3654_s2 + $0xc0] sm:$0xff] }
  0x12   :  { %222 = vmatpush.bf16.msra.mxu2 %v2753_v27  ;;  %v540_v47 = vpack.c.b16 %v528_v44, %v528_v44  ;;  %v2773_v53 = vld [vmem:[%s3654_s2 + $0xac] sm:$0xff]  ;;  %v2772_v57 = vld [vmem:[%s3654_s2 + $0xa4] sm:$0xff]  ;;  %v2771_v61 = vld [vmem:[%s3654_s2 + $0x9c] sm:$0xff] }
  0x13   :  { %v216_v48 = vand.u32 %v199_v45, %v3017_v6  ;;  %v345_v49 = vand.u32 %v332_v46, %v3017_v6  ;;  %v2785_v59 = vld [vmem:[%s3654_s2 + $0x100] sm:$0xff]  ;;  %v2776_v62 = vld [vmem:[%s3654_s2 + $0xb8] sm:$0xff]  ;;  %v2299_v1 = vld [vmem:[%s3654_s2 + $0x16c] sm:$0x7] }
  0x14   :  { %106 = vmatpush.bf16.msrb.mxu1 %v2055_v25  ;;  %v553_v51 = vand.u32 %v540_v47, %v3017_v6  ;;  %v2758_v60 = vld [vmem:[%s3654_s2 + $0x40] sm:$0xff]  ;;  %v2784_v63 = vld [vmem:[%s3654_s2 + $0xf8] sm:$0xff]  ;;  %v700_v3 = vunpack.c.l.b16 %v2299_v1  ;;  %v2381_v13 = vld [vmem:[%s3654_s2 + $0x1c8] sm:$0x7] }
  0x15   :  { %351 = vmatpush.bf16.msra.mxu0 %v2766_v31  ;;  %236 = vmatpush.bf16.msra.mxu3 %v216_v48  ;;  %v2799_v12 = vld [vmem:[%s3654_s2 + $0x164] sm:$0xff]  ;;  %v2798_v14 = vld [vmem:[%s3654_s2 + $0x15c] sm:$0xff]  ;;  %v872_v16 = vunpack.c.l.b16 %v2381_v13  ;;  %v2797_v17 = vld [vmem:[%s3654_s2 + $0x154] sm:$0xff] }
  0x16   :  { %223 = vmatpush.bf16.msra.mxu2 %v2752_v28  ;;  %v712_v5 = vpack.c.b16 %v700_v3, %v700_v3  ;;  %v2812_v23 = vld [vmem:[%s3654_s2 + $0x1c0] sm:$0xff]  ;;  %v2811_v24 = vld [vmem:[%s3654_s2 + $0x1b8] sm:$0xff]  ;;  %v2810_v25 = vld [vmem:[%s3654_s2 + $0x1b0] sm:$0xff] }
  0x17   :  { %v884_v18 = vpack.c.b16 %v872_v16, %v872_v16  ;;  %v2774_v39 = vld [vmem:[%s3655_s3 + $0x10] sm:$0xff]  ;;  %v2804_v1 = vld [vmem:[%s3654_s2 + $0x180] sm:$0xff] }
  0x18   :  { %365 = vmatpush.bf16.msra.mxu1 %v345_v49  ;;  %v725_v9 = vand.u32 %v712_v5, %v3017_v6  ;;  %v2796_v48 = vld [vmem:[%s3654_s2 + $0x14c] sm:$0xff]  ;;  %v2790_v3 = vld [vmem:[%s3654_s2 + $0x11c] sm:$0xff] }
  0x19   :  { %352 = vmatpush.bf16.msra.mxu0 %v2765_v33  ;;  %237 = vmatpush.bf16.msra.mxu3 %v2760_v52  ;;  %v2761_v52 = vld [vmem:[%s3655_s3] sm:$0xff] }
  0x1a   :  { %224 = vmatpush.bf16.msra.mxu2 %v2751_v29  ;;  %v2787_v5 = vld [vmem:[%s3655_s3 + $0x20] sm:$0xff] }
  0x1c   :  { %366 = vmatpush.bf16.msra.mxu1 %v2773_v53 }
  0x1d   :  { %353 = vmatpush.bf16.msra.mxu0 %v2764_v35  ;;  %238 = vmatpush.bf16.msra.mxu3 %v2759_v56  ;;  %v2794_v56 = vld [vmem:[%s3654_s2 + $0x13c] sm:$0xff] }
  0x1e   :  { %225 = vmatpush.bf16.msra.mxu2 %v2750_v30 }
  0x1f   :  { %2057 = vmatmul.msk.bf16.vlgmr.msrb.gmra.mxu1 %vm71_vm2, %v2047_v22  ;;  %v897_v22 = vand.u32 %v884_v18, %v3017_v6 }
  0x20   :  { %367 = vmatpush.bf16.msra.mxu1 %v2772_v57  ;;  %v2807_v57 = vld [vmem:[%s3654_s2 + $0x198] sm:$0xff] }
  0x21   :  { %354 = vmatpush.bf16.msra.mxu0 %v2763_v40  ;;  %239 = vmatpush.bf16.msra.mxu3 %v2758_v60  ;;  %v2806_v60 = vld [vmem:[%s3654_s2 + $0x190] sm:$0xff] }
  0x22   :  { %555 = vmatpush.bf16.msrb.mxu2 %v2783_v32 }
  0x24   :  { %368 = vmatpush.bf16.msra.mxu1 %v2771_v61  ;;  %v2792_v61 = vld [vmem:[%s3654_s2 + $0x12c] sm:$0xff] }
  0x25   :  { %573 = vmatpush.bf16.msrb.mxu0 %v553_v51 }
  0x26   :  { %556 = vmatpush.bf16.msrb.mxu2 %v2782_v34 }
  0x29   :  { %574 = vmatpush.bf16.msrb.mxu0 %v2786_v55  ;;  %v2808_v55 = vld [vmem:[%s3654_s2 + $0x1a0] sm:$0xff] }
  0x2a   :  { %557 = vmatpush.bf16.msrb.mxu2 %v2781_v36 }
  0x2d   :  { %575 = vmatpush.bf16.msrb.mxu0 %v2785_v59  ;;  %v2793_v59 = vld [vmem:[%s3654_s2 + $0x134] sm:$0xff] }
  0x2e   :  { %558 = vmatpush.bf16.msrb.mxu2 %v2780_v41 }
  0x31   :  { %576 = vmatpush.bf16.msrb.mxu0 %v2784_v63  ;;  %v2762_v63 = vld [vmem:[%s3655_s3 + $0x8] sm:$0xff] }
  0x32   :  { %559 = vmatpush.bf16.msrb.mxu2 %v2779_v50  ;;  %v2809_v50 = vld [vmem:[%s3654_s2 + $0x1a8] sm:$0xff] }
  0x36   :  { %560 = vmatpush.bf16.msrb.mxu2 %v2778_v54  ;;  %v2795_v54 = vld [vmem:[%s3654_s2 + $0x144] sm:$0xff] }
  0x3a   :  { %561 = vmatpush.bf16.msrb.mxu2 %v2777_v58  ;;  %v2775_v58 = vld [vmem:[%s3655_s3 + $0x18] sm:$0xff] }
  0x3e   :  { %562 = vmatpush.bf16.msrb.mxu2 %v2776_v62  ;;  %v2805_v62 = vld [vmem:[%s3654_s2 + $0x188] sm:$0xff] }
  0x8c   :  { %v94_v0 = vpop.f32.mrf.mxu1 }
  0x8d   :  { %2893 = vtanh.f32 %v94_v0  ;;  %v2791_v0 = vld [vmem:[%s3654_s2 + $0x124] sm:$0xff] }
  0x93   :  { %v2894_v7 = vpop.eup %2893 }
  0x94   :  { %v96_v4 = vpop.f32.mrf.mxu1 }
  0x95   :  { %2895 = vtanh.f32 %v96_v4  ;;  %v2803_v4 = vld [vmem:[%s3654_s2 + $0x178] sm:$0xff] }
  0x9b   :  { %v2896_v8 = vpop.eup %2895 }
  0x9c   :  { %v3153_v10 = vpack.c.bf16 %v2896_v8, %v2894_v7  ;;  %v108_v11 = vpop.f32.mrf.mxu1  ;;  %v2789_v7 = vld [vmem:[%s3654_s2 + $0x114] sm:$0xff] }
  0x9d   :  { %2897 = vtanh.f32 %v108_v11  ;;  %v2802_v8 = vld [vmem:[%s3654_s2 + $0x170] sm:$0xff] }
  0x9e   :  { %226 = vmatmul.bf16.vlgmr.msra.gmra.mxu2 %v3153_v10  ;;  %355 = vmatmul.bf16.vlgmr.msra.gmra.mxu0 %v3153_v10 }
  0x9f   :  { %745 = vmatpush.bf16.msra.mxu0 %v725_v9  ;;  %v2788_v9 = vld [vmem:[%s3655_s3 + $0x28] sm:$0xff] }
  0xa3   :  { %746 = vmatpush.bf16.msra.mxu0 %v2799_v12  ;;  %v2898_v19 = vpop.eup %2897 }
  0xa4   :  { %v110_v15 = vpop.f32.mrf.mxu1 }
  0xa5   :  { %2899 = vtanh.f32 %v110_v15 }
  0xa7   :  { %747 = vmatpush.bf16.msra.mxu0 %v2798_v14 }
  0xab   :  { %v2900_v20 = vpop.eup %2899  ;;  %748 = vmatpush.bf16.msra.mxu0 %v2797_v17 }
  0xac   :  { %v118_v21 = vpack.c.bf16 %v2900_v20, %v2898_v19 }
  0xae   :  { %2102 = vmatmul.msk.bf16.vlgmr.msra.gmra.mxu3 %vm211_vm3, %v118_v21  ;;  %2170 = vmatmul.msk.bf16.vlgmr.msra.gmra.mxu1 %vm211_vm3, %v118_v21 }
  0xaf   :  { %563 = vmatmul.bf16.vlgmr.msrb.gmra.mxu2 %v3153_v10  ;;  %2262 = vmatmul.msk.bf16.vlgmr.msrb.gmra.mxu0 %vm211_vm3, %v118_v21 }
  0xb0   :  { %917 = vmatpush.bf16.msrb.mxu0 %v897_v22 }
  0xb4   :  { %918 = vmatpush.bf16.msrb.mxu0 %v2812_v23 }
  0xb8   :  { %919 = vmatpush.bf16.msrb.mxu0 %v2811_v24 }
  0xbc   :  { %920 = vmatpush.bf16.msrb.mxu0 %v2810_v25 }
  0xbf   :  { %2344 = vmatmul.msk.bf16.vlgmr.msra.gmra.mxu0 %vm211_vm3, %v118_v21 }
  0xcf   :  { %2426 = vmatmul.msk.bf16.vlgmr.msrb.gmra.mxu0 %vm211_vm3, %v118_v21 }
 0x11b   :  { %v356_v26 = vpop.f32.mrf.mxu0 }
 0x121   :  { %v227_v27 = vpop.f32.mrf.mxu2 }
 0x123   :  { %v358_v28 = vpop.f32.mrf.mxu0 }
 0x129   :  { %v229_v29 = vpop.f32.mrf.mxu2 }
 0x12b   :  { %v370_v30 = vpop.f32.mrf.mxu1 }
 0x12c   :  { %v578_v31 = vpop.f32.mrf.mxu0  ;;  %v371_v35 = vadd.f32 %v370_v30, %v356_v26 }
 0x131   :  { %v241_v32 = vpop.f32.mrf.mxu3 }
 0x132   :  { %v564_v33 = vpop.f32.mrf.mxu2  ;;  %v242_v41 = vadd.f32 %v241_v32, %v227_v27 }
 0x133   :  { %v372_v34 = vpop.f32.mrf.mxu1  ;;  %v579_v45 = vadd.f32 %v578_v31, %v564_v33 }
 0x134   :  { %v373_v36 = vadd.f32 %v372_v34, %v358_v28  ;;  %v580_v42 = vpop.f32.mrf.mxu0  ;;  %v2800_v34 = vld [vmem:[%s3655_s3 + $0x30] sm:$0xff] }
 0x136   :  { %v380_v37 = vpack.c.bf16 %v373_v36, %v371_v35 }
 0x138   :  { %v400_v38 = vsel %vm398_vm4, %v380_v37, 0  ;;  %v975_v37 = vld [vmem:[%s3656_s4] sm:$0xff] }
 0x139   :  { %v243_v40 = vpop.f32.mrf.mxu3  ;;  %409 = vmatpush.bf16.msrb.mxu3 %v400_v38  ;;  %v2938_v38 = vmov 0  }
 0x13a   :  { %v244_v43 = vadd.f32 %v243_v40, %v229_v29  ;;  %v566_v44 = vpop.f32.mrf.mxu2  ;;  %2889 = vset.pattern.permute.xlu0 %v2938_v38  ;;  %2890 = vset.pattern.permute.xlu1 %v2938_v38  ;;  %v976_v40 = vld [vmem:[%s3656_s4 + $0x8] sm:$0xff] }
 0x13b   :  { %v581_v46 = vadd.f32 %v580_v42, %v566_v44  ;;  %981 = vperm.xlu0 %2889, %v975_v37   ;;  %v2801_v42 = vld [vmem:[%s3655_s3 + $0x38] sm:$0xff] }
 0x13c   :  { %v250_v47 = vpack.c.bf16 %v244_v43, %v242_v41  ;;  %2183 = vmatmul.msk.bf16.vlgmr.msrb.gmra.mxu3 %vm391_vm5, %v2774_v39  ;;  %v750_v23 = vpop.f32.mrf.mxu0 }
 0x13d   :  { %v588_v49 = vpack.c.bf16 %v581_v46, %v579_v45  ;;  %v977_v45 = vld [vmem:[%s3656_s4 + $0x10] sm:$0xff]  ;;  %v978_v46 = vld [vmem:[%s3656_s4 + $0x18] sm:$0xff] }
 0x13e   :  { %v438_v51 = vsel %vm398_vm4, %v250_v47, 0  ;;  %991 = vperm.xlu1 %2890, %v977_v45  }
 0x13f   :  { %447 = vmatpush.bf16.msrb.mxu1 %v438_v51  ;;  %v606_v53 = vsel %vm398_vm4, %v588_v49, 0 }
 0x140   :  { %615 = vmatpush.bf16.msra.mxu3 %v606_v53  ;;  %v2813_v53 = vld [vmem:[%s3655_s3 + $0x40] sm:$0xff] }
 0x142   :  { %2193 = vmatmul.msk.bf16.vlgmr.msrb.gmra.mxu1 %vm391_vm5, %v2761_v52 }
 0x143   :  { %727 = vmatpush.bf16.msra.mxu1 %v2796_v48  ;;  %986 = vperm.xlu0 %2889, %v976_v40   ;;  %v2836_v40 = vld [vmem:[%s3658_s6 + $0x7c] sm:$0x10] }
 0x144   :  { %899 = vmatpush.bf16.msrb.mxu3 %v2809_v50  ;;  %v752_v27 = vpop.f32.mrf.mxu0 }
 0x146   :  { %996 = vperm.xlu1 %2890, %v978_v46   ;;  %v2489_v46 = vld [vmem:[%s3658_s6 + $0x30] sm:$0xf] }
 0x147   :  { %728 = vmatpush.bf16.msra.mxu1 %v2795_v54  ;;  %v2814_v54 = vld [vmem:[%s3655_s3 + $0x48] sm:$0xff] }
 0x148   :  { %900 = vmatpush.bf16.msrb.mxu3 %v2808_v55  ;;  %v1019_v55 = vld [vmem:[%s3657_s5 + $0x28] sm:$0x7] }
 0x14b   :  { %729 = vmatpush.bf16.msra.mxu1 %v2794_v56  ;;  %v1041_v56 = vunpack.c.l.b16 %v1019_v55 }
 0x14c   :  { %901 = vmatpush.bf16.msrb.mxu3 %v2807_v57  ;;  %v922_v43 = vpop.f32.mrf.mxu0 }
 0x14d   :  { %2184 = vmatmul.msk.bf16.gmra.mxu3 %vm391_vm5, %v2775_v58  ;;  %v1047_v57 = vpack.c.b16 %v1041_v56, %v1041_v56  ;;  %v2827_v56 = vld [vmem:[%s3658_s6 + $0x3c] sm:$0xf] }
 0x14f   :  { %730 = vmatpush.bf16.msra.mxu1 %v2793_v59  ;;  %v1061_v58 = vand.u32 %v1047_v57, %v3017_v6  ;;  %v2819_v59 = vld [vmem:[%s3657_s5 + $0x20] sm:$0xff]  ;;  %v2816_v6 = vld [vmem:[%s3657_s5 + $0x8] sm:$0xff]  ;;  %v2499_v57 = vld [vmem:[%s3658_s6 + $0x50] sm:$0xf0] }
 0x150   :  { %902 = vmatpush.bf16.msrb.mxu3 %v2806_v60  ;;  %v2818_v60 = vld [vmem:[%s3657_s5 + $0x18] sm:$0xff] }
 0x151   :  { %1065 = vmatpush.bf16.msra.mxu0 %v1061_v58 }
 0x152   :  { %2194 = vmatmul.msk.bf16.gmra.mxu1 %vm391_vm5, %v2762_v63 }
 0x153   :  { %731 = vmatpush.bf16.msra.mxu1 %v2792_v61  ;;  %v2817_v61 = vld [vmem:[%s3657_s5 + $0x10] sm:$0xff] }
 0x154   :  { %903 = vmatpush.bf16.msrb.mxu3 %v2805_v62  ;;  %v924_v47 = vpop.f32.mrf.mxu0  ;;  %v2815_v62 = vld [vmem:[%s3657_s5] sm:$0xff] }
 0x155   :  { %1066 = vmatpush.bf16.msra.mxu0 %v2819_v59  ;;  %v2502_v59 = vor.u32 %v2827_v56, %v2499_v57 }
 0x157   :  { %732 = vmatpush.bf16.msra.mxu1 %v2791_v0 }
 0x158   :  { %904 = vmatpush.bf16.msrb.mxu3 %v2804_v1 }
 0x159   :  { %1067 = vmatpush.bf16.msra.mxu0 %v2818_v60  ;;  %v2465_v60 = vld [vmem:[%s3658_s6] sm:$0xf] }
 0x15b   :  { %733 = vmatpush.bf16.msra.mxu1 %v2790_v3 }
 0x15c   :  { %905 = vmatpush.bf16.msrb.mxu3 %v2803_v4 }
 0x15d   :  { %2275 = vmatmul.msk.bf16.vlgmr.msra.gmra.mxu3 %vm391_vm5, %v2787_v5  ;;  %1068 = vmatpush.bf16.msra.mxu0 %v2817_v61  ;;  %v2823_v61 = vld [vmem:[%s3658_s6 + $0x14] sm:$0xf0] }
 0x15f   :  { %734 = vmatpush.bf16.msra.mxu1 %v2789_v7 }
 0x160   :  { %906 = vmatpush.bf16.msrb.mxu3 %v2802_v8 }
 0x161   :  { %1069 = vmatpush.bf16.msra.mxu0 %v2816_v6  ;;  %v2820_v6 = vld [vmem:[%s3658_s6 + $0x4] sm:$0xf] }
 0x162   :  { %735 = vmatmul.bf16.vlgmr.msra.gmra.mxu1 %v3153_v10 }
 0x165   :  { %1070 = vmatpush.bf16.msra.mxu0 %v2815_v62  ;;  %v2466_v62 = vor.u32 %v2823_v61, %v2465_v60  ;;  %v3453_v61 = vld [vmem:[%s3659_s7 + $0x30] sm:$0xff] }
 0x16d   :  { %2276 = vmatmul.msk.bf16.gmra.mxu3 %vm391_vm5, %v2788_v9 }
 0x17d   :  { %907 = vmatmul.bf16.vlgmr.msrb.gmra.mxu3 %v3153_v10 }
 0x1ad   :  { %v982_v0 = vpop.permute.xlu0 %981 }
 0x1bf   :  { %v411_v11 = vpop.f32.mrf.mxu3  ;;  %v449_v12 = vpop.f32.mrf.mxu1 }
 0x1c0   :  { %v450_v13 = vadd.f32 %v449_v12, %v411_v11 }
 0x1c7   :  { %v413_v14 = vpop.f32.mrf.mxu3  ;;  %v451_v15 = vpop.f32.mrf.mxu1 }
 0x1c8   :  { %v452_v16 = vadd.f32 %v451_v15, %v413_v14  ;;  %v992_v15 = vpop.permute.xlu1 %991 }
 0x1cf   :  { %v454_v18 = vpop.f32.mrf.mxu1 }
 0x1d0   :  { %v416_v17 = vpop.f32.mrf.mxu3 }
 0x1d1   :  { %v455_v19 = vadd.f32 %v454_v18, %v416_v17 }
 0x1d7   :  { %v456_v21 = vpop.f32.mrf.mxu1 }
 0x1d8   :  { %v418_v20 = vpop.f32.mrf.mxu3 }
 0x1d9   :  { %v457_v22 = vadd.f32 %v456_v21, %v418_v20 }
 0x1df   :  { %v736_v25 = vpop.f32.mrf.mxu1 }
 0x1e0   :  { %v617_v24 = vpop.f32.mrf.mxu3  ;;  %v751_v10 = vadd.f32 %v750_v23, %v736_v25 }
 0x1e1   :  { %v627_v26 = vadd.f32 %v617_v24, %v450_v13  ;;  %v987_v13 = vpop.permute.xlu0 %986 }
 0x1e7   :  { %v738_v29 = vpop.f32.mrf.mxu1 }
 0x1e8   :  { %v619_v28 = vpop.f32.mrf.mxu3  ;;  %v753_v31 = vadd.f32 %v752_v27, %v738_v29  ;;  %v997_v27 = vpop.permute.xlu1 %996 }
 0x1e9   :  { %v628_v30 = vadd.f32 %v619_v28, %v452_v16 }
 0x1ea   :  { %v760_v32 = vpack.c.bf16 %v753_v31, %v751_v10  ;;  %v2513_v31 = vld [vmem:[%s3658_s6 + $0x60] sm:$0xf] }
 0x1ec   :  { %v778_v33 = vsel %vm398_vm4, %v760_v32, 0  ;;  %v2835_v32 = vld [vmem:[%s3658_s6 + $0x74] sm:$0x10] }
 0x1ed   :  { %787 = vmatpush.bf16.msra.mxu2 %v778_v33  ;;  %v2514_v33 = vor.u32 %v2835_v32, %v2513_v31 }
 0x1f0   :  { %v622_v35 = vpop.f32.mrf.mxu3  ;;  %2357 = vmatmul.msk.bf16.vlgmr.msra.gmra.mxu2 %vm391_vm5, %v2800_v34  ;;  %v1195_v34 = vsel %vm1193_vm7, 4294967295, %v2937_v2 }
 0x1f1   :  { %v3266_v36 = vadd.f32 %v622_v35, %v455_v19  ;;  %v2832_v35 = vld [vmem:[%s3658_s6 + $0x64] sm:$0xf]  ;;  %v1196_v37 = vsel %vm1194_vm8, %v1195_v34, 0 }
 0x1f8   :  { %v624_v39 = vpop.f32.mrf.mxu3 }
 0x1f9   :  { %v630_v41 = vadd.f32 %v624_v39, %v457_v22  ;;  %v2521_v39 = vld [vmem:[%s3658_s6 + $0x68] sm:$0xf] }
 0x1fa   :  { %v2522_v2 = vor.u32 %v2836_v40, %v2521_v39 }
 0x200   :  { %v908_v44 = vpop.f32.mrf.mxu3  ;;  %2358 = vmatmul.msk.bf16.gmra.mxu2 %vm391_vm5, %v2801_v42  ;;  %v2833_v42 = vld [vmem:[%s3658_s6 + $0x6c] sm:$0xf] }
 0x201   :  { %v923_v49 = vadd.f32 %v922_v43, %v908_v44  ;;  %v2523_v43 = vld [vmem:[%s3658_s6 + $0x80] sm:$0x10] }
 0x202   :  { %v2526_v45 = vor.u32 %v2833_v42, %v2523_v43 }
 0x208   :  { %v910_v48 = vpop.f32.mrf.mxu3 }
 0x209   :  { %v925_v50 = vadd.f32 %v924_v47, %v910_v48  ;;  %v2829_v47 = vld [vmem:[%s3658_s6 + $0x44] sm:$0xf0]  ;;  %v2826_v48 = vld [vmem:[%s3658_s6 + $0x34] sm:$0xf] }
 0x20b   :  { %v932_v51 = vpack.c.bf16 %v925_v50, %v923_v49  ;;  %v1204_v49 = vand.u32 %v2522_v2, %v1196_v37  ;;  %v2490_v50 = vor.u32 %v2829_v47, %v2489_v46  ;;  %v1348_v46 = vld [vmem:[%s3659_s7 + $0x38] sm:$0xff] }
 0x20d   :  { %v950_v52 = vsel %vm398_vm4, %v932_v51, 0  ;;  %v2491_v51 = vld [vmem:[%s3658_s6 + $0x48] sm:$0xf0] }
 0x20e   :  { %959 = vmatpush.bf16.msrb.mxu1 %v950_v52  ;;  %v2497_v52 = vld [vmem:[%s3658_s6 + $0x38] sm:$0xf]  ;;  %v2494_v55 = vor.u32 %v2826_v48, %v2491_v51 }
 0x211   :  { %2439 = vmatmul.msk.bf16.vlgmr.msrb.gmra.mxu1 %vm391_vm5, %v2813_v53  ;;  %v2830_v53 = vld [vmem:[%s3658_s6 + $0x4c] sm:$0xf0] }
 0x212   :  { %1258 = vmatpush.bf16.msra.mxu1 %v1204_v49  ;;  %v2498_v58 = vor.u32 %v2830_v53, %v2497_v52  ;;  %v1351_v49 = vld [vmem:[%s3659_s7 + $0x50] sm:$0xff]  ;;  %v1345_v52 = vld [vmem:[%s3659_s7 + $0x20] sm:$0xff] }
 0x216   :  { %1259 = vmatpush.bf16.msra.mxu1 %v2498_v58  ;;  %v1397_v58 = vunpack.c.l.bf16 %v1351_v49 }
 0x221   :  { %2440 = vmatmul.msk.bf16.gmra.mxu1 %vm391_vm5, %v2814_v54  ;;  %v1207_v54 = vand.u32 %v2526_v45, %v1196_v37 }
 0x223   :  { %1277 = vmatpush.bf16.msrb.mxu0 %v1207_v54  ;;  %v1391_v54 = vunpack.c.l.bf16 %v1348_v46 }
 0x227   :  { %1278 = vmatpush.bf16.msrb.mxu0 %v2502_v59 }
 0x273   :  { %v789_v63 = vpop.f32.mrf.mxu2 }
 0x274   :  { %v799_v4 = vadd.f32 %v789_v63, %v627_v26  ;;  %v2467_v63 = vld [vmem:[%s3658_s6 + $0x18] sm:$0xf0] }
 0x27b   :  { %v791_v1 = vpop.f32.mrf.mxu2 }
 0x27c   :  { %v800_v7 = vadd.f32 %v791_v1, %v628_v30  ;;  %v2824_v1 = vld [vmem:[%s3658_s6 + $0x1c] sm:$0xf0] }
 0x283   :  { %v794_v12 = vpop.f32.mrf.mxu2 }
 0x284   :  { %v801_v18 = vadd.f32 %v794_v12, %v3266_v36  ;;  %v2515_v36 = vld [vmem:[%s3658_s6 + $0x78] sm:$0x10]  ;;  %v2834_v12 = vld [vmem:[%s3658_s6 + $0x74] sm:$0xf] }
 0x285   :  { %v2518_v38 = vor.u32 %v2832_v35, %v2515_v36 }
 0x287   :  { %v1201_v44 = vand.u32 %v2518_v38, %v1196_v37 }
 0x289   :  { %1239 = vmatpush.bf16.msra.mxu3 %v1201_v44  ;;  %v1342_v44 = vld [vmem:[%s3659_s7 + $0x8] sm:$0xff] }
 0x28b   :  { %v796_v20 = vpop.f32.mrf.mxu2 }
 0x28c   :  { %v802_v23 = vadd.f32 %v796_v20, %v630_v41  ;;  %v1198_v41 = vand.u32 %v2514_v33, %v1196_v37  ;;  %v2507_v20 = vld [vmem:[%s3658_s6 + $0x58] sm:$0xf0] }
 0x28d   :  { %1240 = vmatpush.bf16.msra.mxu3 %v2494_v55  ;;  %v1392_v55 = vunpack.c.h.bf16 %v1348_v46 }
 0x28e   :  { %v961_v3 = vpop.f32.mrf.mxu1  ;;  %1220 = vmatpush.bf16.msrb.mxu2 %v1198_v41 }
 0x28f   :  { %v971_v5 = vadd.f32 %v961_v3, %v799_v4  ;;  %v2470_v3 = vor.u32 %v2820_v6, %v2467_v63  ;;  %v1380_v63 = vunpack.c.h.bf16 %v1342_v44 }
 0x291   :  { %v999_v8 = vadd.f32 %v982_v0, %v971_v5  ;;  %v2473_v0 = vld [vmem:[%s3658_s6 + $0x8] sm:$0xf]  ;;  %v2821_v5 = vld [vmem:[%s3658_s6 + $0xc] sm:$0xf]  ;;  %1241 = vmatpush.bf16.msra.mxu3 %v2470_v3 }
 0x292   :  { %1221 = vmatpush.bf16.msrb.mxu2 %v2490_v50  ;;  %v2474_v4 = vor.u32 %v2824_v1, %v2473_v0  ;;  %v1379_v50 = vunpack.c.l.bf16 %v1342_v44  ;;  %v1385_v0 = vunpack.c.l.bf16 %v1345_v52  ;;  %v1386_v1 = vunpack.c.h.bf16 %v1345_v52 }
 0x293   :  { %2901 = vtanh.f32 %v999_v8 }
 0x294   :  { %1260 = vmatpush.bf16.msra.mxu1 %v2474_v4 }
 0x296   :  { %v963_v9 = vpop.f32.mrf.mxu1  ;;  %1222 = vmatpush.bf16.msrb.mxu2 %v2466_v62  ;;  %v1398_v62 = vunpack.c.h.bf16 %v1351_v49 }
 0x297   :  { %v972_v11 = vadd.f32 %v963_v9, %v800_v7  ;;  %v2475_v7 = vld [vmem:[%s3658_s6 + $0x20] sm:$0xf0]  ;;  %v2529_v9 = vld [vmem:[%s3658_s6 + $0x70] sm:$0xf] }
 0x298   :  { %v2478_v8 = vor.u32 %v2821_v5, %v2475_v7 }
 0x299   :  { %v1000_v14 = vadd.f32 %v987_v13, %v972_v11  ;;  %v2902_v17 = vpop.eup %2901  ;;  %v2837_v11 = vld [vmem:[%s3658_s6 + $0x84] sm:$0x10] }
 0x29a   :  { %1279 = vmatpush.bf16.msrb.mxu0 %v2478_v8  ;;  %v2530_v13 = vor.u32 %v2837_v11, %v2529_v9  ;;  %v1350_v9 = vld [vmem:[%s3659_s7 + $0x48] sm:$0xff] }
 0x29b   :  { %2903 = vtanh.f32 %v1000_v14  ;;  %v2531_v14 = vld [vmem:[%s3658_s6 + $0x88] sm:$0x10] }
 0x29e   :  { %v966_v16 = vpop.f32.mrf.mxu1 }
 0x29f   :  { %v973_v22 = vadd.f32 %v966_v16, %v801_v18  ;;  %v2505_v16 = vld [vmem:[%s3658_s6 + $0x40] sm:$0xf]  ;;  %v1210_v18 = vand.u32 %v2530_v13, %v1196_v37 }
 0x2a1   :  { %v2904_v19 = vpop.eup %2903  ;;  %v1001_v24 = vadd.f32 %v992_v15, %v973_v22  ;;  %v2534_v15 = vor.u32 %v2834_v12, %v2531_v14  ;;  %1296 = vmatpush.bf16.msra.mxu2 %v1210_v18  ;;  %v1389_v14 = vunpack.c.l.bf16 %v3453_v61 }
 0x2a2   :  { %v1007_v21 = vpack.c.bf16 %v2904_v19, %v2902_v17  ;;  %v2831_v17 = vld [vmem:[%s3658_s6 + $0x54] sm:$0xf0]  ;;  %v2828_v19 = vld [vmem:[%s3658_s6 + $0x44] sm:$0xf] }
 0x2a3   :  { %2905 = vtanh.f32 %v1001_v24  ;;  %v1213_v22 = vand.u32 %v2534_v15, %v1196_v37  ;;  %v2510_v24 = vor.u32 %v2828_v19, %v2507_v20  ;;  %v1344_v15 = vld [vmem:[%s3659_s7 + $0x18] sm:$0xff] }
 0x2a4   :  { %2461 = vmatmul.msk.bf16.vlgmr.msra.gmra.mxu0 %vm1053_vm6, %v1007_v21 }
 0x2a5   :  { %1315 = vmatpush.bf16.msrb.mxu3 %v1213_v22 }
 0x2a6   :  { %v968_v25 = vpop.f32.mrf.mxu1 }
 0x2a7   :  { %v974_v26 = vadd.f32 %v968_v25, %v802_v23  ;;  %v2506_v23 = vor.u32 %v2831_v17, %v2505_v16  ;;  %v2481_v25 = vld [vmem:[%s3658_s6 + $0x10] sm:$0xf] }
 0x2a9   :  { %v1002_v28 = vadd.f32 %v997_v27, %v974_v26  ;;  %v2906_v29 = vpop.eup %2905  ;;  %v2825_v26 = vld [vmem:[%s3658_s6 + $0x24] sm:$0xf0]  ;;  %v2822_v27 = vld [vmem:[%s3658_s6 + $0x14] sm:$0xf]  ;;  %1297 = vmatpush.bf16.msra.mxu2 %v2506_v23  ;;  %1316 = vmatpush.bf16.msrb.mxu3 %v2510_v24 }
 0x2ab   :  { %2907 = vtanh.f32 %v1002_v28  ;;  %v2483_v28 = vld [vmem:[%s3658_s6 + $0x28] sm:$0xf0]  ;;  %s2035_s6 = sshll.u32 %s3665_s13, 4  ;;  %s2036_s6 = int_to_ptr.hbm [resolvable:$true] %s2035_s6 }
 0x2b1   :  { %v2908_v10 = vpop.eup %2907 }
 0x2b2   :  { %v1008_v30 = vpack.c.bf16 %v2908_v10, %v2906_v29  ;;  %v2482_v29 = vor.u32 %v2825_v26, %v2481_v25  ;;  %v2486_v10 = vor.u32 %v2822_v27, %v2483_v28  ;;  %v1395_v25 = vunpack.c.l.bf16 %v1350_v9  ;;  %v1341_v26 = vld [vmem:[%s3659_s7] sm:$0xff] }
 0x2b4   :  { %2462 = vmatmul.msk.bf16.gmra.mxu0 %vm1053_vm6, %v1008_v30  ;;  %1298 = vmatpush.bf16.msra.mxu2 %v2482_v29 }
 0x2b5   :  { %1317 = vmatpush.bf16.msrb.mxu3 %v2486_v10 }
 0x321   :  { %v1072_v21 = vpop.f32.mrf.mxu0 }
 0x329   :  { %v1074_v30 = vpop.f32.mrf.mxu0 }
 0x32a   :  { %v1082_v31 = vpack.c.bf16 %v1074_v30, %v1072_v21 }
 0x32c   :  { %2535 = vmatmul.msk.bf16.vlgmr.msrb.gmra.mxu2 %vm1186_vm9, %v1082_v31  ;;  %2537 = vmatmul.msk.bf16.vlgmr.msra.gmra.mxu3 %vm1186_vm9, %v1082_v31 }
 0x32d   :  { %2539 = vmatmul.msk.bf16.vlgmr.msra.gmra.mxu1 %vm1186_vm9, %v1082_v31  ;;  %2541 = vmatmul.msk.bf16.vlgmr.msrb.gmra.mxu0 %vm1186_vm9, %v1082_v31 }
 0x331   :  { %v1077_v32 = vpop.f32.mrf.mxu0 }
 0x339   :  { %v1079_v33 = vpop.f32.mrf.mxu0 }
 0x33a   :  { %v1083_v34 = vpack.c.bf16 %v1079_v33, %v1077_v32 }
 0x33c   :  { %2536 = vmatmul.msk.bf16.gmra.mxu2 %vm1186_vm9, %v1083_v34  ;;  %2538 = vmatmul.msk.bf16.gmra.mxu3 %vm1186_vm9, %v1083_v34 }
 0x33d   :  { %2540 = vmatmul.msk.bf16.gmra.mxu1 %vm1186_vm9, %v1083_v34  ;;  %2542 = vmatmul.msk.bf16.gmra.mxu0 %vm1186_vm9, %v1083_v34 }
 0x34c   :  { %2543 = vmatmul.msk.bf16.vlgmr.msra.gmra.mxu2 %vm1186_vm9, %v1082_v31  ;;  %2545 = vmatmul.msk.bf16.vlgmr.msrb.gmra.mxu3 %vm1186_vm9, %v1082_v31  ;;  %v1383_v31 = vunpack.c.l.bf16 %v1344_v15 }
 0x35c   :  { %2544 = vmatmul.msk.bf16.gmra.mxu2 %vm1186_vm9, %v1083_v34  ;;  %2546 = vmatmul.msk.bf16.gmra.mxu3 %vm1186_vm9, %v1083_v34 }
 0x3aa   :  { %v1262_v35 = vpop.f32.mrf.mxu1  ;;  %v1281_v36 = vpop.f32.mrf.mxu0 }
 0x3ab   :  { %v1330_v53 = vpack.c.bf16 %v1281_v36, %v1262_v35  ;;  %v1396_v36 = vunpack.c.h.bf16 %v1350_v9 }
 0x3ad   :  { %v1355_v11 = vunpack.c.l.bf16 %v1330_v53  ;;  %v1356_v12 = vunpack.c.h.bf16 %v1330_v53  ;;  %v1378_v53 = vunpack.c.h.bf16 %v1341_v26 }
 0x3af   :  { %v1224_v37 = vpop.f32.mrf.mxu2  ;;  %v1243_v38 = vpop.f32.mrf.mxu3  ;;  %v1403_v33 = vmul.f32 %v1379_v50, %v1355_v11  ;;  %v1404_v34 = vmul.f32 %v1380_v63, %v1356_v12  ;;  %v2853_v63 = vld [vmem:[%s3661_s9 + $0x78] sm:$0xff]  ;;  %v1349_v11 = vld [vmem:[%s3659_s7 + $0x40] sm:$0xff] }
 0x3b0   :  { %v1329_v22 = vpack.c.bf16 %v1243_v38, %v1224_v37  ;;  %v1377_v38 = vunpack.c.l.bf16 %v1341_v26  ;;  %v1352_v12 = vld [vmem:[%s3659_s7 + $0x58] sm:$0xff] }
 0x3b1   :  { %v1400_v26 = vunpack.c.h.bf16 %v1352_v12 }
 0x3b2   :  { %v1264_v39 = vpop.f32.mrf.mxu1  ;;  %v1283_v40 = vpop.f32.mrf.mxu0  ;;  %v1353_v37 = vunpack.c.l.bf16 %v1329_v22  ;;  %v1354_v52 = vunpack.c.h.bf16 %v1329_v22  ;;  %v1343_v22 = vld [vmem:[%s3659_s7 + $0x10] sm:$0xff] }
 0x3b3   :  { %v1333_v51 = vpack.c.bf16 %v1283_v40, %v1264_v39 }
 0x3b5   :  { %v1361_v4 = vunpack.c.l.bf16 %v1333_v51  ;;  %v1362_v5 = vunpack.c.h.bf16 %v1333_v51  ;;  %v1401_v51 = vmul.f32 %v1377_v38, %v1353_v37 }
 0x3b7   :  { %v1226_v41 = vpop.f32.mrf.mxu2  ;;  %v1245_v2 = vpop.f32.mrf.mxu3  ;;  %v1409_v27 = vmul.f32 %v1385_v0, %v1361_v4  ;;  %v1410_v28 = vmul.f32 %v1386_v1, %v1362_v5  ;;  %v2844_v0 = vld [vmem:[%s3661_s9 + $0x30] sm:$0xff]  ;;  %v2851_v4 = vld [vmem:[%s3661_s9 + $0x68] sm:$0xff] }
 0x3b8   :  { %v1332_v13 = vpack.c.bf16 %v1245_v2, %v1226_v41  ;;  %v1390_v2 = vunpack.c.h.bf16 %v3453_v61  ;;  %v2852_v1 = vld [vmem:[%s3661_s9 + $0x70] sm:$0xff] }
 0x3ba   :  { %v1267_v42 = vpop.f32.mrf.mxu1  ;;  %v1286_v43 = vpop.f32.mrf.mxu0  ;;  %v1359_v30 = vunpack.c.l.bf16 %v1332_v13  ;;  %v1360_v46 = vunpack.c.h.bf16 %v1332_v13  ;;  %v2841_v13 = vld [vmem:[%s3661_s9 + $0x18] sm:$0xff] }
 0x3bb   :  { %v1336_v45 = vpack.c.bf16 %v1286_v43, %v1267_v42  ;;  %v1427_v42 = vpack.c.bf16 %v1409_v27, %v1403_v33  ;;  %v1428_v43 = vpack.c.bf16 %v1410_v28, %v1404_v34 }
 0x3bc   :  { %v1407_v44 = vmul.f32 %v1383_v31, %v1359_v30 }
 0x3bd   :  { %v1367_v59 = vunpack.c.l.bf16 %v1336_v45  ;;  %v1368_v60 = vunpack.c.h.bf16 %v1336_v45 }
 0x3bf   :  { %v1229_v47 = vpop.f32.mrf.mxu2  ;;  %v1248_v48 = vpop.f32.mrf.mxu3  ;;  %v1415_v16 = vmul.f32 %v1391_v54, %v1367_v59  ;;  %v1416_v17 = vmul.f32 %v1392_v55, %v1368_v60  ;;  %v3469_v55 = vld [vmem:[%s3660_s8] sm:$0x1]  ;;  %v1402_v59 = vmul.f32 %v1378_v53, %v1354_v52  ;;  %v2869_v52 = vld [vmem:[%s3661_s9 + $0xf8] sm:$0xff] }
 0x3c0   :  { %v1335_v3 = vpack.c.bf16 %v1248_v48, %v1229_v47  ;;  %v1384_v47 = vunpack.c.h.bf16 %v1344_v15  ;;  %v1346_v15 = vld [vmem:[%s3659_s7 + $0x28] sm:$0xff]  ;;  %v2850_v53 = vld [vmem:[%s3661_s9 + $0x60] sm:$0xff] }
 0x3c1   :  { %v1387_v27 = vunpack.c.l.bf16 %v1346_v15  ;;  %v1388_v28 = vunpack.c.h.bf16 %v1346_v15  ;;  %v2872_v15 = vld [vmem:[%s3661_s9 + $0x110] sm:$0xff] }
 0x3c2   :  { %v1269_v56 = vpop.f32.mrf.mxu1  ;;  %v1288_v57 = vpop.f32.mrf.mxu0  ;;  %v1365_v23 = vunpack.c.l.bf16 %v1335_v3  ;;  %v1366_v41 = vunpack.c.h.bf16 %v1335_v3  ;;  %v2843_v3 = vld [vmem:[%s3661_s9 + $0x28] sm:$0xff] }
 0x3c3   :  { %v1339_v6 = vpack.c.bf16 %v1288_v57, %v1269_v56  ;;  %v1425_v56 = vpack.c.bf16 %v1407_v44, %v1401_v51  ;;  %v1408_v57 = vmul.f32 %v1384_v47, %v1360_v46  ;;  %v2861_v46 = vld [vmem:[%s3661_s9 + $0xb8] sm:$0xff]  ;;  %v2859_v51 = vld [vmem:[%s3661_s9 + $0xa8] sm:$0xff] }
 0x3c4   :  { %v1413_v39 = vmul.f32 %v1389_v14, %v1365_v23  ;;  %v1414_v54 = vmul.f32 %v1390_v2, %v1366_v41 }
 0x3c5   :  { %v1373_v7 = vunpack.c.l.bf16 %v1339_v6  ;;  %v1374_v8 = vunpack.c.h.bf16 %v1339_v6  ;;  %v1426_v6 = vpack.c.bf16 %v1408_v57, %v1402_v59  ;;  %v2868_v57 = vld [vmem:[%s3661_s9 + $0xf0] sm:$0xff]  ;;  %v2867_v59 = vld [vmem:[%s3661_s9 + $0xe8] sm:$0xff] }
 0x3c7   :  { %v1421_v18 = vmul.f32 %v1397_v58, %v1373_v7  ;;  %v1422_v19 = vmul.f32 %v1398_v62, %v1374_v8  ;;  %v1231_v20 = vpop.f32.mrf.mxu2  ;;  %v1250_v21 = vpop.f32.mrf.mxu3  ;;  %v2845_v62 = vld [vmem:[%s3661_s9 + $0x38] sm:$0xff]  ;;  %v2842_v8 = vld [vmem:[%s3661_s9 + $0x20] sm:$0xff] }
 0x3c8   :  { %v1338_v24 = vpack.c.bf16 %v1250_v21, %v1231_v20  ;;  %v1399_v21 = vunpack.c.l.bf16 %v1352_v12  ;;  %v2873_v12 = vld [vmem:[%s3661_s9 + $0x118] sm:$0xff] }
 0x3c9   :  { %v1433_v29 = vpack.c.bf16 %v1421_v18, %v1415_v16  ;;  %v1434_v10 = vpack.c.bf16 %v1422_v19, %v1416_v17  ;;  %v1393_v17 = vunpack.c.l.bf16 %v1349_v11  ;;  %v1394_v18 = vunpack.c.h.bf16 %v1349_v11  ;;  %v2863_v11 = vld [vmem:[%s3661_s9 + $0xc8] sm:$0xff] }
 0x3ca   :  { %v1371_v32 = vunpack.c.l.bf16 %v1338_v24  ;;  %v1372_v35 = vunpack.c.h.bf16 %v1338_v24 }
 0x3cb   :  { %1474 = vmatpush.bf16.msra.mxu0 %v1433_v29  ;;  %1487 = vmatpush.bf16.msrb.mxu2 %v1434_v10  ;;  %v2840_v29 = vld [vmem:[%s3661_s9 + $0x10] sm:$0xff] }
 0x3cc   :  { %v1419_v40 = vmul.f32 %v1395_v25, %v1371_v32  ;;  %v1420_v48 = vmul.f32 %v1396_v36, %v1372_v35  ;;  %v1381_v35 = vunpack.c.l.bf16 %v1343_v22  ;;  %v1382_v36 = vunpack.c.h.bf16 %v1343_v22 }
 0x3ce   :  { %v1431_v45 = vpack.c.bf16 %v1419_v40, %v1413_v39  ;;  %v1432_v58 = vpack.c.bf16 %v1420_v48, %v1414_v54  ;;  %v2838_v54 = vld [vmem:[%s3661_s9] sm:$0xff] }
 0x3cf   :  { %1475 = vmatpush.bf16.msra.mxu0 %v1427_v42  ;;  %1488 = vmatpush.bf16.msrb.mxu2 %v1428_v43  ;;  %v1300_v49 = vpop.f32.mrf.mxu2  ;;  %v1319_v50 = vpop.f32.mrf.mxu3 }
 0x3d0   :  { %1448 = vmatpush.bf16.msrb.mxu1 %v1431_v45  ;;  %v1331_v16 = vpack.c.bf16 %v1319_v50, %v1300_v49  ;;  %v2860_v49 = vld [vmem:[%s3661_s9 + $0xb0] sm:$0xff]  ;;  %v2839_v50 = vld [vmem:[%s3661_s9 + $0x8] sm:$0xff] }
 0x3d2   :  { %2549 = vmatmul.msk.bf16.vlgmr.msra.gmra.mxu0 %vm1438_vm10, %v3469_v55  ;;  %2550 = vmatmul.msk.bf16.vlgmr.msrb.gmra.mxu2 %vm1438_vm10, %v3469_v55  ;;  %v1357_v33 = vunpack.c.l.bf16 %v1331_v16  ;;  %v1358_v34 = vunpack.c.h.bf16 %v1331_v16 }
 0x3d3   :  { %1862 = vmatpush.bf16.msrb.mxu0 %v2845_v62  ;;  %1875 = vmatpush.bf16.msra.mxu2 %v2853_v63  ;;  %v2856_v62 = vld [vmem:[%s3661_s9 + $0x90] sm:$0xff]  ;;  %v2866_v63 = vld [vmem:[%s3661_s9 + $0xe0] sm:$0xff] }
 0x3d4   :  { %1449 = vmatpush.bf16.msrb.mxu1 %v1425_v56  ;;  %v1405_v44 = vmul.f32 %v1381_v35, %v1357_v33  ;;  %v1406_v45 = vmul.f32 %v1382_v36, %v1358_v34  ;;  %v2858_v56 = vld [vmem:[%s3661_s9 + $0xa0] sm:$0xff]  ;;  %v1956_v35 = vld [vmem:[%s3663_s11 + $0x38] sm:$0xf] }
 0x3d5   :  { %v1990_v36 = vunpack.c.l.b16 %v1956_v35 }
 0x3d7   :  { %v1302_v60 = vpop.f32.mrf.mxu2  ;;  %v1321_v61 = vpop.f32.mrf.mxu3  ;;  %2547 = vmatmul.msk.bf16.vlgmr.msrb.gmra.mxu1 %vm1438_vm10, %v3469_v55  ;;  %1863 = vmatpush.bf16.msrb.mxu0 %v2844_v0  ;;  %v2876_v0 = vld [vmem:[%s3661_s9 + $0x130] sm:$0xff] }
 0x3d8   :  { %1461 = vmatpush.bf16.msra.mxu1 %v1432_v58  ;;  %1876 = vmatpush.bf16.msra.mxu2 %v2852_v1  ;;  %v1334_v14 = vpack.c.bf16 %v1321_v61, %v1302_v60  ;;  %v2857_v58 = vld [vmem:[%s3661_s9 + $0x98] sm:$0xff]  ;;  %v2848_v60 = vld [vmem:[%s3661_s9 + $0x50] sm:$0xff]  ;;  %v2855_v1 = vld [vmem:[%s3661_s9 + $0x88] sm:$0xff] }
 0x3d9   :  { %v2877_v61 = vld [vmem:[%s3661_s9 + $0x138] sm:$0xff] }
 0x3da   :  { %v1363_v10 = vunpack.c.l.bf16 %v1334_v14  ;;  %v1364_v30 = vunpack.c.h.bf16 %v1334_v14 }
 0x3db   :  { %1864 = vmatpush.bf16.msrb.mxu0 %v2843_v3  ;;  %v2865_v3 = vld [vmem:[%s3661_s9 + $0xd8] sm:$0xff] }
 0x3dc   :  { %1462 = vmatpush.bf16.msra.mxu1 %v1426_v6  ;;  %1877 = vmatpush.bf16.msra.mxu2 %v2851_v4  ;;  %v1411_v41 = vmul.f32 %v1387_v27, %v1363_v10  ;;  %v1412_v2 = vmul.f32 %v1388_v28, %v1364_v30  ;;  %v2847_v6 = vld [vmem:[%s3661_s9 + $0x48] sm:$0xff]  ;;  %v2846_v4 = vld [vmem:[%s3661_s9 + $0x40] sm:$0xff] }
 0x3de   :  { %v1429_v47 = vpack.c.bf16 %v1411_v41, %v1405_v44  ;;  %v1430_v48 = vpack.c.bf16 %v1412_v2, %v1406_v45  ;;  %v2883_v41 = vld [vmem:[%s3663_s11 + $0x20] sm:$0xff]  ;;  %v2882_v44 = vld [vmem:[%s3663_s11 + $0x18] sm:$0xff] }
 0x3df   :  { %v1305_v5 = vpop.f32.mrf.mxu2  ;;  %v1324_v7 = vpop.f32.mrf.mxu3  ;;  %1865 = vmatpush.bf16.msrb.mxu0 %v2842_v8  ;;  %v2864_v8 = vld [vmem:[%s3661_s9 + $0xd0] sm:$0xff] }
 0x3e0   :  { %v1337_v9 = vpack.c.bf16 %v1324_v7, %v1305_v5  ;;  %1878 = vmatpush.bf16.msra.mxu2 %v2850_v53  ;;  %v2875_v5 = vld [vmem:[%s3661_s9 + $0x128] sm:$0xff]  ;;  %v2854_v7 = vld [vmem:[%s3661_s9 + $0x80] sm:$0xff] }
 0x3e2   :  { %v1369_v23 = vunpack.c.l.bf16 %v1337_v9  ;;  %v1370_v24 = vunpack.c.h.bf16 %v1337_v9  ;;  %v2874_v9 = vld [vmem:[%s3661_s9 + $0x120] sm:$0xff] }
 0x3e3   :  { %1866 = vmatpush.bf16.msrb.mxu0 %v2841_v13  ;;  %v2862_v13 = vld [vmem:[%s3661_s9 + $0xc0] sm:$0xff] }
 0x3e4   :  { %v1417_v37 = vmul.f32 %v1393_v17, %v1369_v23  ;;  %v1418_v38 = vmul.f32 %v1394_v18, %v1370_v24  ;;  %v2878_v17 = vld [vmem:[%s3661_s9 + $0x140] sm:$0xff] }
 0x3e5   :  { %v2870_v24 = vld [vmem:[%s3661_s9 + $0x100] sm:$0xff] }
 0x3e7   :  { %v1307_v19 = vpop.f32.mrf.mxu2  ;;  %v1326_v20 = vpop.f32.mrf.mxu3  ;;  %2548 = vmatmul.msk.bf16.vlgmr.msra.gmra.mxu1 %vm1438_vm10, %v3469_v55  ;;  %1867 = vmatpush.bf16.msrb.mxu0 %v2840_v29 }
 0x3e8   :  { %v1340_v25 = vpack.c.bf16 %v1326_v20, %v1307_v19 }
 0x3ea   :  { %v1375_v31 = vunpack.c.l.bf16 %v1340_v25  ;;  %v1376_v32 = vunpack.c.h.bf16 %v1340_v25 }
 0x3eb   :  { %1868 = vmatpush.bf16.msrb.mxu0 %v2839_v50  ;;  %v2879_v50 = vld [vmem:[%s3663_s11] sm:$0xff] }
 0x3ec   :  { %v1423_v39 = vmul.f32 %v1399_v21, %v1375_v31  ;;  %v1424_v40 = vmul.f32 %v1400_v26, %v1376_v32  ;;  %v2871_v21 = vld [vmem:[%s3661_s9 + $0x108] sm:$0xff] }
 0x3ee   :  { %v1435_v42 = vpack.c.bf16 %v1423_v39, %v1417_v37  ;;  %v1436_v43 = vpack.c.bf16 %v1424_v40, %v1418_v38  ;;  %v1998_v37 = vpack.c.b16 %v1990_v36, %v1990_v36  ;;  %v2885_v39 = vld [vmem:[%s3663_s11 + $0x30] sm:$0xff]  ;;  %v2884_v40 = vld [vmem:[%s3663_s11 + $0x28] sm:$0xff] }
 0x3ef   :  { %1869 = vmatpush.bf16.msrb.mxu0 %v2838_v54 }
 0x3f0   :  { %1500 = vmatpush.bf16.msra.mxu3 %v1435_v42  ;;  %1513 = vmatpush.bf16.msrb.mxu1 %v1436_v43  ;;  %v2011_v38 = vsel %vm1193_vm7, %v1998_v37, 0 }
 0x3f3   :  { %1914 = vmatpush.bf16.msra.mxu0 %v2877_v61 }
 0x3f4   :  { %1501 = vmatpush.bf16.msra.mxu3 %v1429_v47  ;;  %1514 = vmatpush.bf16.msrb.mxu1 %v1430_v48 }
 0x3f7   :  { %2551 = vmatmul.msk.bf16.vlgmr.msra.gmra.mxu3 %vm1438_vm10, %v3469_v55  ;;  %2552 = vmatmul.msk.bf16.vlgmr.msrb.gmra.mxu1 %vm1438_vm10, %v3469_v55  ;;  %v2849_v55 = vld [vmem:[%s3661_s9 + $0x58] sm:$0xff] }
 0x3f8   :  { %1888 = vmatpush.bf16.msrb.mxu3 %v2861_v46  ;;  %1901 = vmatpush.bf16.msra.mxu1 %v2869_v52  ;;  %v2881_v46 = vld [vmem:[%s3663_s11 + $0x10] sm:$0xff]  ;;  %v2891_v52 = vld [vmem:[%s3662_s10] ss:$0 sm:$0xff]  ;;  %s2939_s10 = smov [#allocation2]  }
 0x3f9   :  { %1879 = vmatpush.bf16.msra.mxu2 %v2849_v55  ;;  %1915 = vmatpush.bf16.msra.mxu0 %v2876_v0  ;;  %s2033_s5 = sshll.u32 %s2939_s10, 4  ;;  %s2034_s5 = int_to_ptr.vmem [resolvable:$true] %s2033_s5 }
 0x3fc   :  { %1889 = vmatpush.bf16.msrb.mxu3 %v2860_v49  ;;  %1902 = vmatpush.bf16.msra.mxu1 %v2868_v57  ;;  %v2880_v49 = vld [vmem:[%s3663_s11 + $0x8] sm:$0xff] }
 0x3fd   :  { %1880 = vmatpush.bf16.msra.mxu2 %v2848_v60  ;;  %1916 = vmatpush.bf16.msra.mxu0 %v2875_v5 }
 0x400   :  { %1890 = vmatpush.bf16.msrb.mxu3 %v2859_v51  ;;  %1903 = vmatpush.bf16.msra.mxu1 %v2867_v59 }
 0x401   :  { %1881 = vmatpush.bf16.msra.mxu2 %v2847_v6  ;;  %1917 = vmatpush.bf16.msra.mxu0 %v2874_v9 }
 0x404   :  { %1891 = vmatpush.bf16.msrb.mxu3 %v2858_v56  ;;  %1904 = vmatpush.bf16.msra.mxu1 %v2866_v63 }
 0x405   :  { %1882 = vmatpush.bf16.msra.mxu2 %v2846_v4  ;;  %1918 = vmatpush.bf16.msra.mxu0 %v2873_v12 }
 0x408   :  { %1892 = vmatpush.bf16.msrb.mxu3 %v2857_v58  ;;  %1905 = vmatpush.bf16.msra.mxu1 %v2865_v3 }
 0x409   :  { %1919 = vmatpush.bf16.msra.mxu0 %v2872_v15  ;;  %1934 = vmatpush.bf16.msrb.mxu2 %v2878_v17 }
 0x40c   :  { %1893 = vmatpush.bf16.msrb.mxu3 %v2856_v62  ;;  %1906 = vmatpush.bf16.msra.mxu1 %v2864_v8 }
 0x40d   :  { %1920 = vmatpush.bf16.msra.mxu0 %v2871_v21 }
 0x410   :  { %1894 = vmatpush.bf16.msrb.mxu3 %v2855_v1  ;;  %1907 = vmatpush.bf16.msra.mxu1 %v2863_v11  ;;  %v2892_v1 = vld [vmem:[%s3664_s12] ss:$0 sm:$0xff] }
 0x411   :  { %1921 = vmatpush.bf16.msra.mxu0 %v2870_v24 }
 0x414   :  { %1895 = vmatpush.bf16.msrb.mxu3 %v2854_v7  ;;  %1908 = vmatpush.bf16.msra.mxu1 %v2862_v13 }
 0x418   :  { %2013 = vmatpush.bf16.msra.mxu3 %v2011_v38 }
 0x41c   :  { %2014 = vmatpush.bf16.msra.mxu3 %v2885_v39 }
 0x420   :  { %2015 = vmatpush.bf16.msra.mxu3 %v2884_v40 }
 0x424   :  { %2016 = vmatpush.bf16.msra.mxu3 %v2883_v41 }
 0x428   :  { %2017 = vmatpush.bf16.msra.mxu3 %v2882_v44 }
 0x42c   :  { %2018 = vmatpush.bf16.msra.mxu3 %v2881_v46 }
 0x430   :  { %2019 = vmatpush.bf16.msra.mxu3 %v2880_v49 }
 0x434   :  { %2020 = vmatpush.bf16.msra.mxu3 %v2879_v50 }
 0x44f   :  { %v1477_v14 = vpop.f32.mrf.mxu0 }
 0x450   :  { %v1522_v16 = vpack.c.bf16 %v1477_v14, %v1477_v14 }
 0x452   :  { %1896 = vmatmul.bf16.vlgmr.msrb.gmra.mxu3 %v1522_v16 }
 0x454   :  { %v1451_v18 = vpop.f32.mrf.mxu1 }
 0x455   :  { %v1520_v19 = vpack.c.bf16 %v1451_v18, %v1451_v18  ;;  %v1490_v20 = vpop.f32.mrf.mxu2 }
 0x456   :  { %v1523_v22 = vpack.c.bf16 %v1490_v20, %v1490_v20 }
 0x457   :  { %1870 = vmatmul.bf16.vlgmr.msrb.gmra.mxu0 %v1520_v19  ;;  %v1479_v23 = vpop.f32.mrf.mxu0 }
 0x458   :  { %1909 = vmatmul.bf16.vlgmr.msra.gmra.mxu1 %v1523_v22 }
 0x45c   :  { %v1453_v25 = vpop.f32.mrf.mxu1 }
 0x45d   :  { %v1492_v26 = vpop.f32.mrf.mxu2 }
 0x464   :  { %v1464_v27 = vpop.f32.mrf.mxu1 }
 0x465   :  { %v1521_v28 = vpack.c.bf16 %v1464_v27, %v1464_v27 }
 0x467   :  { %1883 = vmatmul.bf16.vlgmr.msra.gmra.mxu2 %v1521_v28 }
 0x46c   :  { %v1466_v29 = vpop.f32.mrf.mxu1 }
 0x474   :  { %v1516_v10 = vpop.f32.mrf.mxu1 }
 0x475   :  { %v1525_v30 = vpack.c.bf16 %v1516_v10, %v1516_v10 }
 0x477   :  { %2717 = vmatmul.msk.bf16.vlgmr.msrb.gmra.mxu2 %vm1858_vm11, %v1525_v30 }
 0x47a   :  { %v1503_v31 = vpop.f32.mrf.mxu3 }
 0x47b   :  { %v1524_v32 = vpack.c.bf16 %v1503_v31, %v1503_v31 }
 0x47c   :  { %v1518_v33 = vpop.f32.mrf.mxu1 }
 0x47d   :  { %1922 = vmatmul.bf16.vlgmr.msra.gmra.mxu0 %v1524_v32 }
 0x482   :  { %v1505_v34 = vpop.f32.mrf.mxu3 }
 0x4d4   :  { %v1871_v2 = vpop.f32.mrf.mxu0 }
 0x4d5   :  { %v1897_v42 = vpop.f32.mrf.mxu3  ;;  %v1910_v43 = vpop.f32.mrf.mxu1  ;;  %v1872_v53 = vadd.f32 %v2891_v52, %v1871_v2 }
 0x4dc   :  { %v1873_v45 = vpop.f32.mrf.mxu0 }
 0x4dd   :  { %v1899_v47 = vpop.f32.mrf.mxu3  ;;  %v1912_v48 = vpop.f32.mrf.mxu1 }
 0x4ea   :  { %v1884_v51 = vpop.f32.mrf.mxu2 }
 0x4eb   :  { %v1885_v54 = vadd.f32 %v1884_v51, %v1872_v53 }
 0x4ed   :  { %v1898_v56 = vadd.f32 %v1897_v42, %v1885_v54 }
 0x4ef   :  { %v1911_v57 = vadd.f32 %v1910_v43, %v1898_v56 }
 0x4f2   :  { %v1886_v55 = vpop.f32.mrf.mxu2 }
 0x4fa   :  { %v1923_v58 = vpop.f32.mrf.mxu0  ;;  %v1936_v59 = vpop.f32.mrf.mxu2 }
 0x4fb   :  { %v1924_v60 = vadd.f32 %v1923_v58, %v1911_v57 }
 0x4fd   :  { %v1937_v61 = vadd.f32 %v1936_v59, %v1924_v60 }
 0x4ff   :  { %2909 = vtanh.f32 %v1937_v61 }
 0x502   :  { %v1925_v6 = vpop.f32.mrf.mxu0  ;;  %v1938_v62 = vpop.f32.mrf.mxu2 }
 0x505   :  { %v2910_v63 = vpop.eup %2909 }
 0x506   :  { %v1941_v0 = vpack.c.bf16 %v2910_v63, %v2910_v63 }
 0x508   :  { %2746 = vmatmul.msk.bf16.vlgmr.msra.gmra.mxu3 %vm2006_vm12, %v1941_v0 }
 0x58b   :  { %v2022_v3 = vpop.f32.mrf.mxu3 }
 0x58c   :  { %v2023_v4 = vadd.f32 %v2892_v1, %v2022_v3 }
 0x58e   :  { %2027 = vst.msk [vmem:[#allocation2] sm:$0x3] %vm2026_vm13, %v2023_v4 }
 0x58f   :  { %2038 = dma.vmem_to_hbm [thread:$0]  %s2034_s5, 32, %s2036_s6, [#allocation3]  }
 0x593   :  { %v2024_v5 = vpop.f32.mrf.mxu3 }
 0x594   :  { %2935 = dma.done.wait [#allocation3], 32  }
 0x595   :  { %2936 = vsyncadd [#allocation3], 4294967264 }
 0x596   :  { %2043 = vsyncpa [#allocation3], 1 }

</bundles_post_ra>
